<compile_context>
chip_gen: v6e
topology: v6e:2x2x1
jax: 0.10.0
libtpu: 0.0.40
codegen_flags: <defaults>
</compile_context>

<pallas_src>
import math

import jax
import jax.numpy as jnp
from jax import lax
from jax.experimental import pallas as pl
from jax.experimental.pallas import tpu as pltpu

# Small synthetic shapes.
B, S, H, F = 2, 8, 32, 64          # batch, seq, hidden, ffn
NUM_LAYERS = 2
VOCAB = 64
LN_EPS = 1e-5


def _layernorm(v, g, b):
    mu = jnp.mean(v, axis=-1, keepdims=True)
    var = jnp.mean((v - mu) ** 2, axis=-1, keepdims=True)
    return (v - mu) * lax.rsqrt(var + LN_EPS) * g + b


# ---------------------------------------------------------------------------
# Fused kernel: NUM_LAYERS encoder layers -> QA head -> loss.
# Single grid step; all operands resident in VMEM; positions in SMEM.
# ---------------------------------------------------------------------------
def chaii_fused_kernel(x0_ref, bias_ref, wqkv_ref, wo_ref, wffn_ref, vecs_ref,
                       woutT_ref, bout_ref, start_ref, end_ref,
                       logits_ref, loss_ref):
    BS = B * S
    x = x0_ref[...]                                   # (BS, H) f32 (emb done host-side)
    attn_bias = bias_ref[...]                         # (BS, BS) f32, block-diag + key pad

    # ---- encoder layers (Python-unrolled; stacked weights, static index) ---
    for l in range(NUM_LAYERS):
        vec = vecs_ref[l]                             # (8, 3H) f32 bias/LN slab
        bqkv = vec[0:1, :]                            # (1, 3H)
        bo   = vec[1:2, 0:H]
        g1   = vec[2:3, 0:H]
        be1  = vec[3:4, 0:H]
        b1   = vec[4:5, 0:F]
        b2   = vec[5:6, 0:H]
        g2   = vec[6:7, 0:H]
        be2  = vec[7:8, 0:H]

        # Fused QKV projection: one MXU matmul, slice three ways.
        xb = x.astype(jnp.bfloat16)
        qkv = jnp.dot(xb, wqkv_ref[l],
                      preferred_element_type=jnp.float32) + bqkv     # (BS, 3H)
        q = qkv[:, 0:H]
        k = qkv[:, H:2 * H]
        v = qkv[:, 2 * H:3 * H]

        # Block-diagonal attention over the whole (BS, BS) tile.
        # 1/sqrt(H) is already folded into wq at init.
        sc = lax.dot_general(q.astype(jnp.bfloat16), k.astype(jnp.bfloat16),
                             (((1,), (1,)), ((), ())),
                             preferred_element_type=jnp.float32)     # (BS, BS)
        sc = sc + attn_bias
        m = jnp.max(sc, axis=-1, keepdims=True)
        p = jnp.exp(sc - m)
        p = p / jnp.sum(p, axis=-1, keepdims=True)
        ctx = jnp.dot(p.astype(jnp.bfloat16), v.astype(jnp.bfloat16),
                      preferred_element_type=jnp.float32)            # (BS, H)

        attn = jnp.dot(ctx.astype(jnp.bfloat16), wo_ref[l],
                       preferred_element_type=jnp.float32) + bo
        h1 = _layernorm(x + attn, g1, be1)

        wffn_l = wffn_ref[l]                          # (H, 2F) bf16 = [w1 | w2^T]
        w1 = wffn_l[:, 0:F]
        w2t = wffn_l[:, F:2 * F]
        ff = jnp.dot(h1.astype(jnp.bfloat16), w1,
                     preferred_element_type=jnp.float32) + b1
        # TODO(synk): HF encoders default to exact erf GELU; tanh approx kept here.
        ff = jax.nn.gelu(ff, approximate=True)
        ff = lax.dot_general(ff.astype(jnp.bfloat16), w2t,
                             (((1,), (1,)), ((), ())),
                             preferred_element_type=jnp.float32) + b2
        x = _layernorm(h1 + ff, g2, be2)

    # ---- QA head: single MXU matmul -> lane-contiguous (2, BS) logits slab --
    # slab[0, :] = start logits (flattened B*S), slab[1, :] = end logits.
    slab = lax.dot_general(woutT_ref[...].astype(jnp.bfloat16),
                           x.astype(jnp.bfloat16),
                           (((1,), (1,)), ((), ())),
                           preferred_element_type=jnp.float32) + bout_ref[...]
    logits_ref[...] = slab

    # ---- loss: per-head mean CE over batch, then sqrt(start * end) ----------
    # NOTE: like the original nn.CrossEntropyLoss path, positions are NOT
    # clamped; callers must pass valid in-range targets.
    lane = lax.broadcasted_iota(jnp.int32, (1, BS), 1)
    srow = slab[0:1, :]
    erow = slab[1:2, :]
    NEG = jnp.float32(-1e30)                          # finite: no inf-inf NaN risk

    def nll(row, pos_scalar, in_b, base):
        # Cross-entropy NLL for one batch element, computed on the flat row.
        masked = jnp.where(in_b, row, NEG)
        m = jnp.max(masked, axis=-1, keepdims=True)
        lse = m + jnp.log(jnp.sum(jnp.exp(masked - m), axis=-1, keepdims=True))
        hit = lane == (base + pos_scalar)
        tgt = jnp.sum(jnp.where(hit, row, 0.0), axis=-1, keepdims=True)
        return lse - tgt                              # (1, 1)

    s_acc = jnp.zeros((1, 1), jnp.float32)
    e_acc = jnp.zeros((1, 1), jnp.float32)
    for b in range(B):
        in_b = (lane >= b * S) & (lane < (b + 1) * S)
        s_acc = s_acc + nll(srow, start_ref[b], in_b, b * S)
        e_acc = e_acc + nll(erow, end_ref[b], in_b, b * S)
    loss_ref[...] = jnp.sqrt((s_acc / float(B)) * (e_acc / float(B)))


def run_chaii_fused(x0, attn_bias, start_pos, end_pos, p):
    L = NUM_LAYERS
    full = lambda shp: pl.BlockSpec(shp, lambda i: (0,) * len(shp))
    smem = pl.BlockSpec(memory_space=pltpu.MemorySpace.SMEM)
    in_specs = [
        full((B * S, H)),                      # embedded input (f32)
        full((B * S, B * S)),                  # block-diagonal additive attn bias
        full((L, H, 3 * H)),                   # fused QKV weights (bf16, scale folded)
        full((L, H, H)),                       # attn output proj (bf16)
        full((L, H, 2 * F)),                   # [w1 | w2^T] FFN weights (bf16)
        full((L, 8, 3 * H)),                   # biases + LN gammas/betas slab (f32)
        full((2, H)),                          # QA head W^T (f32, cast in-kernel)
        full((2, 1)),                          # QA head bias
        smem, smem,                            # start / end positions (SMEM)
    ]
    out_shapes = (jax.ShapeDtypeStruct((2, B * S), jnp.float32),   # logits slab
                  jax.ShapeDtypeStruct((1, 1), jnp.float32))       # loss
    out_specs = (full((2, B * S)), full((1, 1)))
    return pl.pallas_call(
        chaii_fused_kernel,
        out_shape=out_shapes,
        grid=(1,),
        in_specs=in_specs,
        out_specs=out_specs,
        compiler_params=pltpu.CompilerParams(
            dimension_semantics=("arbitrary",),
            vmem_limit_bytes=32 * 1024 * 1024),
    )(x0, attn_bias, p["wqkv"], p["wo"], p["wffn"], p["vecs"],
      p["w_out_t"], p["b_out"], start_pos, end_pos)


# ---------------------------------------------------------------------------
# Parameter init (deterministic, packed per-layer slabs) + end-to-end forward
# ---------------------------------------------------------------------------
def init_params(key):
    def nrm(k, shp):
        return 0.02 * jax.random.normal(k, shp, jnp.float32)

    L = NUM_LAYERS
    W = 3 * H
    key, k_emb, k_pos, k_out = jax.random.split(key, 4)
    tok_emb = nrm(k_emb, (VOCAB, H))
    pos_emb = nrm(k_pos, (S, H))
    # nn.Linear(hidden_size, 2): stored transposed (2, H); row0=start, row1=end.
    w_out_t = nrm(k_out, (H, 2)).T
    b_out = jnp.zeros((2, 1), jnp.float32)

    def padrow(v):
        return jnp.pad(v, (0, W - v.shape[0]))

    wqkv, wo, wffn, vecs = [], [], [], []
    zH = jnp.zeros((H,), jnp.float32)
    zF = jnp.zeros((F,), jnp.float32)
    oH = jnp.ones((H,), jnp.float32)
    for _ in range(L):
        key, kq, kk, kv, ko, k1, k2 = jax.random.split(key, 7)
        # Fold the 1/sqrt(H) attention scale into the Q projection (exact; the
        # Q bias is zero here, otherwise it would be scaled identically).
        wq = nrm(kq, (H, H)) * (1.0 / math.sqrt(H))
        wk = nrm(kk, (H, H))
        wv = nrm(kv, (H, H))
        wo_l = nrm(ko, (H, H))
        w1 = nrm(k1, (H, F))
        w2 = nrm(k2, (F, H))

        wqkv.append(jnp.concatenate([wq, wk, wv], axis=1))     # (H, 3H)
        wo.append(wo_l)                                        # (H, H)
        wffn.append(jnp.concatenate([w1, w2.T], axis=1))       # (H, 2F)
        vecs.append(jnp.stack([
            jnp.zeros((W,), jnp.float32),   # row 0: bqkv = [bq|bk|bv]
            padrow(zH),                     # row 1: bo
            padrow(oH),                     # row 2: ln1 gamma
            padrow(zH),                     # row 3: ln1 beta
            padrow(zF),                     # row 4: ffn b1
            padrow(zH),                     # row 5: ffn b2
            padrow(oH),                     # row 6: ln2 gamma
            padrow(zH),                     # row 7: ln2 beta
        ]))

    return {
        "tok_emb": tok_emb,
        "pos_emb_tiled": jnp.tile(pos_emb, (B, 1)),            # (B*S, H), pre-tiled
        "wqkv": jnp.stack(wqkv).astype(jnp.bfloat16),
        "wo": jnp.stack(wo).astype(jnp.bfloat16),
        "wffn": jnp.stack(wffn).astype(jnp.bfloat16),
        "vecs": jnp.stack(vecs),                               # (L, 8, 3H) f32
        "w_out_t": w_out_t,                                    # (2, H) f32
        "b_out": b_out,                                        # (2, 1) f32
    }


def chaii_forward(params, input_ids, attention_mask,
                  start_positions=None, end_positions=None):
    # Embedding gather + pre-tiled positional add done host-side (plain XLA).
    ids = input_ids.astype(jnp.int32).reshape(-1)                          # (BS,)
    x0 = jnp.take(params["tok_emb"], ids, axis=0) + params["pos_emb_tiled"]

    # Block-diagonal additive attention bias, built once on the host:
    # 0.0 = keep, -1e9 on padded keys, -1e9 on cross-batch blocks.
    keypad = ((attention_mask.astype(jnp.float32) - 1.0) * 1e9).reshape(1, B * S)
    batch_of = jnp.repeat(jnp.arange(B), S)                                # (BS,)
    cross = jnp.where(batch_of[:, None] == batch_of[None, :], 0.0, -1e9)
    attn_bias = cross + keypad                                             # (BS, BS)

    has_loss = start_positions is not None and end_positions is not None
    sp = (start_positions if has_loss else jnp.zeros((B,), jnp.int32)).astype(jnp.int32)
    ep = (end_positions if has_loss else jnp.zeros((B,), jnp.int32)).astype(jnp.int32)

    logits_slab, loss = run_chaii_fused(x0, attn_bias, sp, ep, params)

    start_logits = logits_slab[0].reshape(B, S)
    end_logits = logits_slab[1].reshape(B, S)
    total_loss = loss[0, 0] if has_loss else None
    return total_loss, start_logits, end_logits


if __name__ == "__main__":
    key = jax.random.PRNGKey(0)
    params = init_params(key)

    k_ids = jax.random.fold_in(key, 123)
    input_ids = jax.random.randint(k_ids, (B, S), 0, VOCAB, dtype=jnp.int32)
    attention_mask = jnp.ones((B, S), jnp.int32).at[1, S - 2:].set(0)
    start_positions = jnp.array([1, 2], jnp.int32)
    end_positions = jnp.array([4, 5], jnp.int32)

    total_loss, start_logits, end_logits = chaii_forward(
        params, input_ids, attention_mask, start_positions, end_positions)

    jax.block_until_ready((total_loss, start_logits, end_logits))
    assert start_logits.shape == (B, S) and end_logits.shape == (B, S)
    assert jnp.isfinite(total_loss)
    print("KERNEL_OK")
</pallas_src>

<mosaic_0001>
module attributes {stable_mosaic.version = 11 : i64} {
  func.func @chaii_fused_kernel(%arg0: i32, %arg1: memref<16x32xf32, #tpu.memory_space<vmem>>, %arg2: memref<16x16xf32, #tpu.memory_space<vmem>>, %arg3: memref<2x32x96xbf16, #tpu.memory_space<vmem>>, %arg4: memref<2x32x32xbf16, #tpu.memory_space<vmem>>, %arg5: memref<2x32x128xbf16, #tpu.memory_space<vmem>>, %arg6: memref<2x8x96xf32, #tpu.memory_space<vmem>>, %arg7: memref<2x32xf32, #tpu.memory_space<vmem>>, %arg8: memref<2x1xf32, #tpu.memory_space<vmem>>, %arg9: memref<2xi32, #tpu.memory_space<smem>>, %arg10: memref<2xi32, #tpu.memory_space<smem>>, %arg11: memref<2x16xf32, #tpu.memory_space<vmem>>, %arg12: memref<1x1xf32, #tpu.memory_space<vmem>>) attributes {dimension_semantics = [#tpu.dimension_semantics<arbitrary>], iteration_bounds = array<i64: 1>, scalar_prefetch = 0 : i64, scratch_operands = 0 : i64, tpu.core_type = #tpu.core_type<tc>, window_params = [{pipeline_mode = #tpu.pipeline_mode<synchronous>, transform_indices = @transform_0, window_bounds = array<i64: 16, 32>}, {pipeline_mode = #tpu.pipeline_mode<synchronous>, transform_indices = @transform_1, window_bounds = array<i64: 16, 16>}, {pipeline_mode = #tpu.pipeline_mode<synchronous>, transform_indices = @transform_2, window_bounds = array<i64: 2, 32, 96>}, {pipeline_mode = #tpu.pipeline_mode<synchronous>, transform_indices = @transform_3, window_bounds = array<i64: 2, 32, 32>}, {pipeline_mode = #tpu.pipeline_mode<synchronous>, transform_indices = @transform_4, window_bounds = array<i64: 2, 32, 128>}, {pipeline_mode = #tpu.pipeline_mode<synchronous>, transform_indices = @transform_5, window_bounds = array<i64: 2, 8, 96>}, {pipeline_mode = #tpu.pipeline_mode<synchronous>, transform_indices = @transform_6, window_bounds = array<i64: 2, 32>}, {pipeline_mode = #tpu.pipeline_mode<synchronous>, transform_indices = @transform_7, window_bounds = array<i64: 2, 1>}, {transform_indices = @transform_8, window_bounds = array<i64: 2>}, {transform_indices = @transform_9, window_bounds = array<i64: 2>}, {pipeline_mode = #tpu.pipeline_mode<synchronous>, transform_indices = @transform_10, window_bounds = array<i64: 2, 16>}, {pipeline_mode = #tpu.pipeline_mode<synchronous>, transform_indices = @transform_11, window_bounds = array<i64: 1, 1>}]} {
    %c0 = arith.constant 0 : index
    %c0_0 = arith.constant 0 : index
    %0 = vector.load %arg1[%c0, %c0_0] : memref<16x32xf32, #tpu.memory_space<vmem>>, vector<16x32xf32>
    %c0_1 = arith.constant 0 : index
    %c0_2 = arith.constant 0 : index
    %1 = vector.load %arg2[%c0_1, %c0_2] : memref<16x16xf32, #tpu.memory_space<vmem>>, vector<16x16xf32>
    %c0_3 = arith.constant 0 : index
    %c0_4 = arith.constant 0 : index
    %c0_5 = arith.constant 0 : index
    %2 = vector.load %arg6[%c0_3, %c0_4, %c0_5] : memref<2x8x96xf32, #tpu.memory_space<vmem>>, vector<1x8x96xf32>
    %3 = vector.shape_cast %2 : vector<1x8x96xf32> to vector<8x96xf32>
    %4 = vector.extract_strided_slice %3 {offsets = [0, 0], sizes = [1, 96], strides = [1, 1]} : vector<8x96xf32> to vector<1x96xf32>
    %5 = vector.extract_strided_slice %3 {offsets = [1, 0], sizes = [1, 32], strides = [1, 1]} : vector<8x96xf32> to vector<1x32xf32>
    %6 = vector.extract_strided_slice %3 {offsets = [2, 0], sizes = [1, 32], strides = [1, 1]} : vector<8x96xf32> to vector<1x32xf32>
    %7 = vector.extract_strided_slice %3 {offsets = [3, 0], sizes = [1, 32], strides = [1, 1]} : vector<8x96xf32> to vector<1x32xf32>
    %8 = vector.extract_strided_slice %3 {offsets = [4, 0], sizes = [1, 64], strides = [1, 1]} : vector<8x96xf32> to vector<1x64xf32>
    %9 = vector.extract_strided_slice %3 {offsets = [5, 0], sizes = [1, 32], strides = [1, 1]} : vector<8x96xf32> to vector<1x32xf32>
    %10 = vector.extract_strided_slice %3 {offsets = [6, 0], sizes = [1, 32], strides = [1, 1]} : vector<8x96xf32> to vector<1x32xf32>
    %11 = vector.extract_strided_slice %3 {offsets = [7, 0], sizes = [1, 32], strides = [1, 1]} : vector<8x96xf32> to vector<1x32xf32>
    %12 = arith.truncf %0 : vector<16x32xf32> to vector<16x32xbf16>
    %c0_6 = arith.constant 0 : index
    %c0_7 = arith.constant 0 : index
    %c0_8 = arith.constant 0 : index
    %13 = vector.load %arg3[%c0_6, %c0_7, %c0_8] : memref<2x32x96xbf16, #tpu.memory_space<vmem>>, vector<1x32x96xbf16>
    %14 = vector.shape_cast %13 : vector<1x32x96xbf16> to vector<32x96xbf16>
    %cst = arith.constant dense<0.000000e+00> : vector<16x96xf32>
    %15 = tpu.matmul %12, %14, %cst {dimension_numbers = #tpu.dot_dimension_numbers<[1], [0], [0], [1], [0, 0, 1, 1], [], []>} : vector<16x32xbf16>, vector<32x96xbf16>, vector<16x96xf32> -> vector<16x96xf32>
    %16 = vector.broadcast %4 : vector<1x96xf32> to vector<16x96xf32>
    %17 = arith.addf %15, %16 : vector<16x96xf32>
    %18 = vector.extract_strided_slice %17 {offsets = [0, 0], sizes = [16, 32], strides = [1, 1]} : vector<16x96xf32> to vector<16x32xf32>
    %19 = vector.extract_strided_slice %17 {offsets = [0, 32], sizes = [16, 32], strides = [1, 1]} : vector<16x96xf32> to vector<16x32xf32>
    %20 = vector.extract_strided_slice %17 {offsets = [0, 64], sizes = [16, 32], strides = [1, 1]} : vector<16x96xf32> to vector<16x32xf32>
    %21 = arith.truncf %18 : vector<16x32xf32> to vector<16x32xbf16>
    %22 = arith.truncf %19 : vector<16x32xf32> to vector<16x32xbf16>
    %cst_9 = arith.constant dense<0.000000e+00> : vector<16x16xf32>
    %23 = tpu.matmul %21, %22, %cst_9 {dimension_numbers = #tpu.dot_dimension_numbers<[1], [1], [0], [0], [0, 0, 1, 0], [], []>} : vector<16x32xbf16>, vector<16x32xbf16>, vector<16x16xf32> -> vector<16x16xf32>
    %24 = arith.addf %23, %1 : vector<16x16xf32>
    %cst_10 = arith.constant dense<0xFF800000> : vector<16xf32>
    %25 = vector.multi_reduction <maximumf>, %24, %cst_10 [1] : vector<16x16xf32> to vector<16xf32>
    %26 = vector.shape_cast %25 : vector<16xf32> to vector<16x1xf32>
    %27 = vector.broadcast %26 : vector<16x1xf32> to vector<16x16xf32>
    %28 = arith.subf %24, %27 : vector<16x16xf32>
    %29 = math.exp %28 : vector<16x16xf32>
    %cst_11 = arith.constant dense<0.000000e+00> : vector<16xf32>
    %30 = vector.multi_reduction <add>, %29, %cst_11 [1] : vector<16x16xf32> to vector<16xf32>
    %31 = vector.shape_cast %30 : vector<16xf32> to vector<16x1xf32>
    %32 = vector.broadcast %31 : vector<16x1xf32> to vector<16x16xf32>
    %33 = arith.divf %29, %32 : vector<16x16xf32>
    %34 = arith.truncf %33 : vector<16x16xf32> to vector<16x16xbf16>
    %35 = arith.truncf %20 : vector<16x32xf32> to vector<16x32xbf16>
    %cst_12 = arith.constant dense<0.000000e+00> : vector<16x32xf32>
    %36 = tpu.matmul %34, %35, %cst_12 {dimension_numbers = #tpu.dot_dimension_numbers<[1], [0], [0], [1], [0, 0, 1, 1], [], []>} : vector<16x16xbf16>, vector<16x32xbf16>, vector<16x32xf32> -> vector<16x32xf32>
    %37 = arith.truncf %36 : vector<16x32xf32> to vector<16x32xbf16>
    %c0_13 = arith.constant 0 : index
    %c0_14 = arith.constant 0 : index
    %c0_15 = arith.constant 0 : index
    %38 = vector.load %arg4[%c0_13, %c0_14, %c0_15] : memref<2x32x32xbf16, #tpu.memory_space<vmem>>, vector<1x32x32xbf16>
    %39 = vector.shape_cast %38 : vector<1x32x32xbf16> to vector<32x32xbf16>
    %cst_16 = arith.constant dense<0.000000e+00> : vector<16x32xf32>
    %40 = tpu.matmul %37, %39, %cst_16 {dimension_numbers = #tpu.dot_dimension_numbers<[1], [0], [0], [1], [0, 0, 1, 1], [], []>} : vector<16x32xbf16>, vector<32x32xbf16>, vector<16x32xf32> -> vector<16x32xf32>
    %41 = vector.broadcast %5 : vector<1x32xf32> to vector<16x32xf32>
    %42 = arith.addf %40, %41 : vector<16x32xf32>
    %43 = arith.addf %0, %42 : vector<16x32xf32>
    %cst_17 = arith.constant dense<0.000000e+00> : vector<16xf32>
    %44 = vector.multi_reduction <add>, %43, %cst_17 [1] : vector<16x32xf32> to vector<16xf32>
    %45 = vector.shape_cast %44 : vector<16xf32> to vector<16x1xf32>
    %cst_18 = arith.constant 3.200000e+01 : f32
    %46 = vector.broadcast %cst_18 : f32 to vector<16x1xf32>
    %47 = arith.divf %45, %46 : vector<16x1xf32>
    %48 = vector.broadcast %47 : vector<16x1xf32> to vector<16x32xf32>
    %49 = arith.subf %43, %48 : vector<16x32xf32>
    %50 = arith.mulf %49, %49 : vector<16x32xf32>
    %cst_19 = arith.constant dense<0.000000e+00> : vector<16xf32>
    %51 = vector.multi_reduction <add>, %50, %cst_19 [1] : vector<16x32xf32> to vector<16xf32>
    %52 = vector.shape_cast %51 : vector<16xf32> to vector<16x1xf32>
    %cst_20 = arith.constant 3.200000e+01 : f32
    %53 = vector.broadcast %cst_20 : f32 to vector<16x1xf32>
    %54 = arith.divf %52, %53 : vector<16x1xf32>
    %55 = vector.broadcast %47 : vector<16x1xf32> to vector<16x32xf32>
    %56 = arith.subf %43, %55 : vector<16x32xf32>
    %cst_21 = arith.constant 9.99999974E-6 : f32
    %57 = vector.broadcast %cst_21 : f32 to vector<16x1xf32>
    %58 = arith.addf %54, %57 : vector<16x1xf32>
    %59 = math.rsqrt %58 : vector<16x1xf32>
    %60 = vector.broadcast %59 : vector<16x1xf32> to vector<16x32xf32>
    %61 = arith.mulf %56, %60 : vector<16x32xf32>
    %62 = vector.broadcast %6 : vector<1x32xf32> to vector<16x32xf32>
    %63 = arith.mulf %61, %62 : vector<16x32xf32>
    %64 = vector.broadcast %7 : vector<1x32xf32> to vector<16x32xf32>
    %65 = arith.addf %63, %64 : vector<16x32xf32>
    %c0_22 = arith.constant 0 : index
    %c0_23 = arith.constant 0 : index
    %c0_24 = arith.constant 0 : index
    %66 = vector.load %arg5[%c0_22, %c0_23, %c0_24] : memref<2x32x128xbf16, #tpu.memory_space<vmem>>, vector<1x32x128xbf16>
    %67 = vector.shape_cast %66 : vector<1x32x128xbf16> to vector<32x128xbf16>
    %68 = vector.extract_strided_slice %67 {offsets = [0, 0], sizes = [32, 64], strides = [1, 1]} : vector<32x128xbf16> to vector<32x64xbf16>
    %69 = vector.extract_strided_slice %67 {offsets = [0, 64], sizes = [32, 64], strides = [1, 1]} : vector<32x128xbf16> to vector<32x64xbf16>
    %70 = arith.truncf %65 : vector<16x32xf32> to vector<16x32xbf16>
    %cst_25 = arith.constant dense<0.000000e+00> : vector<16x64xf32>
    %71 = tpu.matmul %70, %68, %cst_25 {dimension_numbers = #tpu.dot_dimension_numbers<[1], [0], [0], [1], [0, 0, 1, 1], [], []>} : vector<16x32xbf16>, vector<32x64xbf16>, vector<16x64xf32> -> vector<16x64xf32>
    %72 = vector.broadcast %8 : vector<1x64xf32> to vector<16x64xf32>
    %73 = arith.addf %71, %72 : vector<16x64xf32>
    %74 = arith.mulf %73, %73 : vector<16x64xf32>
    %75 = arith.mulf %73, %74 : vector<16x64xf32>
    %cst_26 = arith.constant 4.471500e-02 : f32
    %76 = vector.broadcast %cst_26 : f32 to vector<16x64xf32>
    %77 = arith.mulf %76, %75 : vector<16x64xf32>
    %78 = arith.addf %73, %77 : vector<16x64xf32>
    %cst_27 = arith.constant 0.797884583 : f32
    %79 = vector.broadcast %cst_27 : f32 to vector<16x64xf32>
    %80 = arith.mulf %79, %78 : vector<16x64xf32>
    %81 = math.tanh %80 : vector<16x64xf32>
    %cst_28 = arith.constant 1.000000e+00 : f32
    %82 = vector.broadcast %cst_28 : f32 to vector<16x64xf32>
    %83 = arith.addf %82, %81 : vector<16x64xf32>
    %cst_29 = arith.constant 5.000000e-01 : f32
    %84 = vector.broadcast %cst_29 : f32 to vector<16x64xf32>
    %85 = arith.mulf %84, %83 : vector<16x64xf32>
    %86 = arith.mulf %73, %85 : vector<16x64xf32>
    %87 = arith.truncf %86 : vector<16x64xf32> to vector<16x64xbf16>
    %cst_30 = arith.constant dense<0.000000e+00> : vector<16x32xf32>
    %88 = tpu.matmul %87, %69, %cst_30 {dimension_numbers = #tpu.dot_dimension_numbers<[1], [1], [0], [0], [0, 0, 1, 0], [], []>} : vector<16x64xbf16>, vector<32x64xbf16>, vector<16x32xf32> -> vector<16x32xf32>
    %89 = vector.broadcast %9 : vector<1x32xf32> to vector<16x32xf32>
    %90 = arith.addf %88, %89 : vector<16x32xf32>
    %91 = arith.addf %65, %90 : vector<16x32xf32>
    %cst_31 = arith.constant dense<0.000000e+00> : vector<16xf32>
    %92 = vector.multi_reduction <add>, %91, %cst_31 [1] : vector<16x32xf32> to vector<16xf32>
    %93 = vector.shape_cast %92 : vector<16xf32> to vector<16x1xf32>
    %cst_32 = arith.constant 3.200000e+01 : f32
    %94 = vector.broadcast %cst_32 : f32 to vector<16x1xf32>
    %95 = arith.divf %93, %94 : vector<16x1xf32>
    %96 = vector.broadcast %95 : vector<16x1xf32> to vector<16x32xf32>
    %97 = arith.subf %91, %96 : vector<16x32xf32>
    %98 = arith.mulf %97, %97 : vector<16x32xf32>
    %cst_33 = arith.constant dense<0.000000e+00> : vector<16xf32>
    %99 = vector.multi_reduction <add>, %98, %cst_33 [1] : vector<16x32xf32> to vector<16xf32>
    %100 = vector.shape_cast %99 : vector<16xf32> to vector<16x1xf32>
    %cst_34 = arith.constant 3.200000e+01 : f32
    %101 = vector.broadcast %cst_34 : f32 to vector<16x1xf32>
    %102 = arith.divf %100, %101 : vector<16x1xf32>
    %103 = vector.broadcast %95 : vector<16x1xf32> to vector<16x32xf32>
    %104 = arith.subf %91, %103 : vector<16x32xf32>
    %cst_35 = arith.constant 9.99999974E-6 : f32
    %105 = vector.broadcast %cst_35 : f32 to vector<16x1xf32>
    %106 = arith.addf %102, %105 : vector<16x1xf32>
    %107 = math.rsqrt %106 : vector<16x1xf32>
    %108 = vector.broadcast %107 : vector<16x1xf32> to vector<16x32xf32>
    %109 = arith.mulf %104, %108 : vector<16x32xf32>
    %110 = vector.broadcast %10 : vector<1x32xf32> to vector<16x32xf32>
    %111 = arith.mulf %109, %110 : vector<16x32xf32>
    %112 = vector.broadcast %11 : vector<1x32xf32> to vector<16x32xf32>
    %113 = arith.addf %111, %112 : vector<16x32xf32>
    %c1 = arith.constant 1 : index
    %c0_36 = arith.constant 0 : index
    %c0_37 = arith.constant 0 : index
    %114 = vector.load %arg6[%c1, %c0_36, %c0_37] : memref<2x8x96xf32, #tpu.memory_space<vmem>>, vector<1x8x96xf32>
    %115 = vector.shape_cast %114 : vector<1x8x96xf32> to vector<8x96xf32>
    %116 = vector.extract_strided_slice %115 {offsets = [0, 0], sizes = [1, 96], strides = [1, 1]} : vector<8x96xf32> to vector<1x96xf32>
    %117 = vector.extract_strided_slice %115 {offsets = [1, 0], sizes = [1, 32], strides = [1, 1]} : vector<8x96xf32> to vector<1x32xf32>
    %118 = vector.extract_strided_slice %115 {offsets = [2, 0], sizes = [1, 32], strides = [1, 1]} : vector<8x96xf32> to vector<1x32xf32>
    %119 = vector.extract_strided_slice %115 {offsets = [3, 0], sizes = [1, 32], strides = [1, 1]} : vector<8x96xf32> to vector<1x32xf32>
    %120 = vector.extract_strided_slice %115 {offsets = [4, 0], sizes = [1, 64], strides = [1, 1]} : vector<8x96xf32> to vector<1x64xf32>
    %121 = vector.extract_strided_slice %115 {offsets = [5, 0], sizes = [1, 32], strides = [1, 1]} : vector<8x96xf32> to vector<1x32xf32>
    %122 = vector.extract_strided_slice %115 {offsets = [6, 0], sizes = [1, 32], strides = [1, 1]} : vector<8x96xf32> to vector<1x32xf32>
    %123 = vector.extract_strided_slice %115 {offsets = [7, 0], sizes = [1, 32], strides = [1, 1]} : vector<8x96xf32> to vector<1x32xf32>
    %124 = arith.truncf %113 : vector<16x32xf32> to vector<16x32xbf16>
    %c1_38 = arith.constant 1 : index
    %c0_39 = arith.constant 0 : index
    %c0_40 = arith.constant 0 : index
    %125 = vector.load %arg3[%c1_38, %c0_39, %c0_40] : memref<2x32x96xbf16, #tpu.memory_space<vmem>>, vector<1x32x96xbf16>
    %126 = vector.shape_cast %125 : vector<1x32x96xbf16> to vector<32x96xbf16>
    %cst_41 = arith.constant dense<0.000000e+00> : vector<16x96xf32>
    %127 = tpu.matmul %124, %126, %cst_41 {dimension_numbers = #tpu.dot_dimension_numbers<[1], [0], [0], [1], [0, 0, 1, 1], [], []>} : vector<16x32xbf16>, vector<32x96xbf16>, vector<16x96xf32> -> vector<16x96xf32>
    %128 = vector.broadcast %116 : vector<1x96xf32> to vector<16x96xf32>
    %129 = arith.addf %127, %128 : vector<16x96xf32>
    %130 = vector.extract_strided_slice %129 {offsets = [0, 0], sizes = [16, 32], strides = [1, 1]} : vector<16x96xf32> to vector<16x32xf32>
    %131 = vector.extract_strided_slice %129 {offsets = [0, 32], sizes = [16, 32], strides = [1, 1]} : vector<16x96xf32> to vector<16x32xf32>
    %132 = vector.extract_strided_slice %129 {offsets = [0, 64], sizes = [16, 32], strides = [1, 1]} : vector<16x96xf32> to vector<16x32xf32>
    %133 = arith.truncf %130 : vector<16x32xf32> to vector<16x32xbf16>
    %134 = arith.truncf %131 : vector<16x32xf32> to vector<16x32xbf16>
    %cst_42 = arith.constant dense<0.000000e+00> : vector<16x16xf32>
    %135 = tpu.matmul %133, %134, %cst_42 {dimension_numbers = #tpu.dot_dimension_numbers<[1], [1], [0], [0], [0, 0, 1, 0], [], []>} : vector<16x32xbf16>, vector<16x32xbf16>, vector<16x16xf32> -> vector<16x16xf32>
    %136 = arith.addf %135, %1 : vector<16x16xf32>
    %cst_43 = arith.constant dense<0xFF800000> : vector<16xf32>
    %137 = vector.multi_reduction <maximumf>, %136, %cst_43 [1] : vector<16x16xf32> to vector<16xf32>
    %138 = vector.shape_cast %137 : vector<16xf32> to vector<16x1xf32>
    %139 = vector.broadcast %138 : vector<16x1xf32> to vector<16x16xf32>
    %140 = arith.subf %136, %139 : vector<16x16xf32>
    %141 = math.exp %140 : vector<16x16xf32>
    %cst_44 = arith.constant dense<0.000000e+00> : vector<16xf32>
    %142 = vector.multi_reduction <add>, %141, %cst_44 [1] : vector<16x16xf32> to vector<16xf32>
    %143 = vector.shape_cast %142 : vector<16xf32> to vector<16x1xf32>
    %144 = vector.broadcast %143 : vector<16x1xf32> to vector<16x16xf32>
    %145 = arith.divf %141, %144 : vector<16x16xf32>
    %146 = arith.truncf %145 : vector<16x16xf32> to vector<16x16xbf16>
    %147 = arith.truncf %132 : vector<16x32xf32> to vector<16x32xbf16>
    %cst_45 = arith.constant dense<0.000000e+00> : vector<16x32xf32>
    %148 = tpu.matmul %146, %147, %cst_45 {dimension_numbers = #tpu.dot_dimension_numbers<[1], [0], [0], [1], [0, 0, 1, 1], [], []>} : vector<16x16xbf16>, vector<16x32xbf16>, vector<16x32xf32> -> vector<16x32xf32>
    %149 = arith.truncf %148 : vector<16x32xf32> to vector<16x32xbf16>
    %c1_46 = arith.constant 1 : index
    %c0_47 = arith.constant 0 : index
    %c0_48 = arith.constant 0 : index
    %150 = vector.load %arg4[%c1_46, %c0_47, %c0_48] : memref<2x32x32xbf16, #tpu.memory_space<vmem>>, vector<1x32x32xbf16>
    %151 = vector.shape_cast %150 : vector<1x32x32xbf16> to vector<32x32xbf16>
    %cst_49 = arith.constant dense<0.000000e+00> : vector<16x32xf32>
    %152 = tpu.matmul %149, %151, %cst_49 {dimension_numbers = #tpu.dot_dimension_numbers<[1], [0], [0], [1], [0, 0, 1, 1], [], []>} : vector<16x32xbf16>, vector<32x32xbf16>, vector<16x32xf32> -> vector<16x32xf32>
    %153 = vector.broadcast %117 : vector<1x32xf32> to vector<16x32xf32>
    %154 = arith.addf %152, %153 : vector<16x32xf32>
    %155 = arith.addf %113, %154 : vector<16x32xf32>
    %cst_50 = arith.constant dense<0.000000e+00> : vector<16xf32>
    %156 = vector.multi_reduction <add>, %155, %cst_50 [1] : vector<16x32xf32> to vector<16xf32>
    %157 = vector.shape_cast %156 : vector<16xf32> to vector<16x1xf32>
    %cst_51 = arith.constant 3.200000e+01 : f32
    %158 = vector.broadcast %cst_51 : f32 to vector<16x1xf32>
    %159 = arith.divf %157, %158 : vector<16x1xf32>
    %160 = vector.broadcast %159 : vector<16x1xf32> to vector<16x32xf32>
    %161 = arith.subf %155, %160 : vector<16x32xf32>
    %162 = arith.mulf %161, %161 : vector<16x32xf32>
    %cst_52 = arith.constant dense<0.000000e+00> : vector<16xf32>
    %163 = vector.multi_reduction <add>, %162, %cst_52 [1] : vector<16x32xf32> to vector<16xf32>
    %164 = vector.shape_cast %163 : vector<16xf32> to vector<16x1xf32>
    %cst_53 = arith.constant 3.200000e+01 : f32
    %165 = vector.broadcast %cst_53 : f32 to vector<16x1xf32>
    %166 = arith.divf %164, %165 : vector<16x1xf32>
    %167 = vector.broadcast %159 : vector<16x1xf32> to vector<16x32xf32>
    %168 = arith.subf %155, %167 : vector<16x32xf32>
    %cst_54 = arith.constant 9.99999974E-6 : f32
    %169 = vector.broadcast %cst_54 : f32 to vector<16x1xf32>
    %170 = arith.addf %166, %169 : vector<16x1xf32>
    %171 = math.rsqrt %170 : vector<16x1xf32>
    %172 = vector.broadcast %171 : vector<16x1xf32> to vector<16x32xf32>
    %173 = arith.mulf %168, %172 : vector<16x32xf32>
    %174 = vector.broadcast %118 : vector<1x32xf32> to vector<16x32xf32>
    %175 = arith.mulf %173, %174 : vector<16x32xf32>
    %176 = vector.broadcast %119 : vector<1x32xf32> to vector<16x32xf32>
    %177 = arith.addf %175, %176 : vector<16x32xf32>
    %c1_55 = arith.constant 1 : index
    %c0_56 = arith.constant 0 : index
    %c0_57 = arith.constant 0 : index
    %178 = vector.load %arg5[%c1_55, %c0_56, %c0_57] : memref<2x32x128xbf16, #tpu.memory_space<vmem>>, vector<1x32x128xbf16>
    %179 = vector.shape_cast %178 : vector<1x32x128xbf16> to vector<32x128xbf16>
    %180 = vector.extract_strided_slice %179 {offsets = [0, 0], sizes = [32, 64], strides = [1, 1]} : vector<32x128xbf16> to vector<32x64xbf16>
    %181 = vector.extract_strided_slice %179 {offsets = [0, 64], sizes = [32, 64], strides = [1, 1]} : vector<32x128xbf16> to vector<32x64xbf16>
    %182 = arith.truncf %177 : vector<16x32xf32> to vector<16x32xbf16>
    %cst_58 = arith.constant dense<0.000000e+00> : vector<16x64xf32>
    %183 = tpu.matmul %182, %180, %cst_58 {dimension_numbers = #tpu.dot_dimension_numbers<[1], [0], [0], [1], [0, 0, 1, 1], [], []>} : vector<16x32xbf16>, vector<32x64xbf16>, vector<16x64xf32> -> vector<16x64xf32>
    %184 = vector.broadcast %120 : vector<1x64xf32> to vector<16x64xf32>
    %185 = arith.addf %183, %184 : vector<16x64xf32>
    %186 = arith.mulf %185, %185 : vector<16x64xf32>
    %187 = arith.mulf %185, %186 : vector<16x64xf32>
    %cst_59 = arith.constant 4.471500e-02 : f32
    %188 = vector.broadcast %cst_59 : f32 to vector<16x64xf32>
    %189 = arith.mulf %188, %187 : vector<16x64xf32>
    %190 = arith.addf %185, %189 : vector<16x64xf32>
    %cst_60 = arith.constant 0.797884583 : f32
    %191 = vector.broadcast %cst_60 : f32 to vector<16x64xf32>
    %192 = arith.mulf %191, %190 : vector<16x64xf32>
    %193 = math.tanh %192 : vector<16x64xf32>
    %cst_61 = arith.constant 1.000000e+00 : f32
    %194 = vector.broadcast %cst_61 : f32 to vector<16x64xf32>
    %195 = arith.addf %194, %193 : vector<16x64xf32>
    %cst_62 = arith.constant 5.000000e-01 : f32
    %196 = vector.broadcast %cst_62 : f32 to vector<16x64xf32>
    %197 = arith.mulf %196, %195 : vector<16x64xf32>
    %198 = arith.mulf %185, %197 : vector<16x64xf32>
    %199 = arith.truncf %198 : vector<16x64xf32> to vector<16x64xbf16>
    %cst_63 = arith.constant dense<0.000000e+00> : vector<16x32xf32>
    %200 = tpu.matmul %199, %181, %cst_63 {dimension_numbers = #tpu.dot_dimension_numbers<[1], [1], [0], [0], [0, 0, 1, 0], [], []>} : vector<16x64xbf16>, vector<32x64xbf16>, vector<16x32xf32> -> vector<16x32xf32>
    %201 = vector.broadcast %121 : vector<1x32xf32> to vector<16x32xf32>
    %202 = arith.addf %200, %201 : vector<16x32xf32>
    %203 = arith.addf %177, %202 : vector<16x32xf32>
    %cst_64 = arith.constant dense<0.000000e+00> : vector<16xf32>
    %204 = vector.multi_reduction <add>, %203, %cst_64 [1] : vector<16x32xf32> to vector<16xf32>
    %205 = vector.shape_cast %204 : vector<16xf32> to vector<16x1xf32>
    %cst_65 = arith.constant 3.200000e+01 : f32
    %206 = vector.broadcast %cst_65 : f32 to vector<16x1xf32>
    %207 = arith.divf %205, %206 : vector<16x1xf32>
    %208 = vector.broadcast %207 : vector<16x1xf32> to vector<16x32xf32>
    %209 = arith.subf %203, %208 : vector<16x32xf32>
    %210 = arith.mulf %209, %209 : vector<16x32xf32>
    %cst_66 = arith.constant dense<0.000000e+00> : vector<16xf32>
    %211 = vector.multi_reduction <add>, %210, %cst_66 [1] : vector<16x32xf32> to vector<16xf32>
    %212 = vector.shape_cast %211 : vector<16xf32> to vector<16x1xf32>
    %cst_67 = arith.constant 3.200000e+01 : f32
    %213 = vector.broadcast %cst_67 : f32 to vector<16x1xf32>
    %214 = arith.divf %212, %213 : vector<16x1xf32>
    %215 = vector.broadcast %207 : vector<16x1xf32> to vector<16x32xf32>
    %216 = arith.subf %203, %215 : vector<16x32xf32>
    %cst_68 = arith.constant 9.99999974E-6 : f32
    %217 = vector.broadcast %cst_68 : f32 to vector<16x1xf32>
    %218 = arith.addf %214, %217 : vector<16x1xf32>
    %219 = math.rsqrt %218 : vector<16x1xf32>
    %220 = vector.broadcast %219 : vector<16x1xf32> to vector<16x32xf32>
    %221 = arith.mulf %216, %220 : vector<16x32xf32>
    %222 = vector.broadcast %122 : vector<1x32xf32> to vector<16x32xf32>
    %223 = arith.mulf %221, %222 : vector<16x32xf32>
    %224 = vector.broadcast %123 : vector<1x32xf32> to vector<16x32xf32>
    %225 = arith.addf %223, %224 : vector<16x32xf32>
    %c0_69 = arith.constant 0 : index
    %c0_70 = arith.constant 0 : index
    %226 = vector.load %arg7[%c0_69, %c0_70] : memref<2x32xf32, #tpu.memory_space<vmem>>, vector<2x32xf32>
    %227 = arith.truncf %226 : vector<2x32xf32> to vector<2x32xbf16>
    %228 = arith.truncf %225 : vector<16x32xf32> to vector<16x32xbf16>
    %cst_71 = arith.constant dense<0.000000e+00> : vector<2x16xf32>
    %229 = tpu.matmul %227, %228, %cst_71 {dimension_numbers = #tpu.dot_dimension_numbers<[1], [1], [0], [0], [0, 0, 1, 0], [], []>} : vector<2x32xbf16>, vector<16x32xbf16>, vector<2x16xf32> -> vector<2x16xf32>
    %c0_72 = arith.constant 0 : index
    %c0_73 = arith.constant 0 : index
    %230 = vector.load %arg8[%c0_72, %c0_73] : memref<2x1xf32, #tpu.memory_space<vmem>>, vector<2x1xf32>
    %231 = vector.broadcast %230 : vector<2x1xf32> to vector<2x16xf32>
    %232 = arith.addf %229, %231 : vector<2x16xf32>
    %c0_74 = arith.constant 0 : index
    %c0_75 = arith.constant 0 : index
    %233 = vector.load %arg11[%c0_74, %c0_75] : memref<2x16xf32, #tpu.memory_space<vmem>>, vector<2x16xf32>
    tpu.vector_store %arg11[%c0_74, %c0_75], %232 {strides = array<i32>} : memref<2x16xf32, #tpu.memory_space<vmem>>, vector<2x16xf32>,
    %234 = tpu.iota {dimensions = array<i32: 1>} : vector<1x16xi32>
    %235 = vector.extract_strided_slice %232 {offsets = [0, 0], sizes = [1, 16], strides = [1, 1]} : vector<2x16xf32> to vector<1x16xf32>
    %236 = vector.extract_strided_slice %232 {offsets = [1, 0], sizes = [1, 16], strides = [1, 1]} : vector<2x16xf32> to vector<1x16xf32>
    %cst_76 = arith.constant 0.000000e+00 : f32
    %237 = vector.broadcast %cst_76 : f32 to vector<1x1xf32>
    %cst_77 = arith.constant 0.000000e+00 : f32
    %238 = vector.broadcast %cst_77 : f32 to vector<1x1xf32>
    %c0_i32 = arith.constant 0 : i32
    %239 = vector.broadcast %c0_i32 : i32 to vector<1x16xi32>
    %240 = arith.cmpi sge, %234, %239 : vector<1x16xi32>
    %c8_i32 = arith.constant 8 : i32
    %241 = vector.broadcast %c8_i32 : i32 to vector<1x16xi32>
    %242 = arith.cmpi slt, %234, %241 : vector<1x16xi32>
    %243 = arith.andi %240, %242 : vector<1x16xi1>
    %c0_78 = arith.constant 0 : index
    %244 = memref.load %arg9[%c0_78] : memref<2xi32, #tpu.memory_space<smem>>
    %cst_79 = arith.constant -1.000000e+30 : f32
    %245 = vector.broadcast %cst_79 : f32 to vector<1x16xf32>
    %246 = arith.select %243, %235, %245 : vector<1x16xi1>, vector<1x16xf32>
    %cst_80 = arith.constant dense<0xFF800000> : vector<1xf32>
    %247 = vector.multi_reduction <maximumf>, %246, %cst_80 [1] : vector<1x16xf32> to vector<1xf32>
    %248 = vector.shape_cast %247 : vector<1xf32> to vector<1x1xf32>
    %249 = vector.broadcast %248 : vector<1x1xf32> to vector<1x16xf32>
    %250 = arith.subf %246, %249 : vector<1x16xf32>
    %251 = math.exp %250 : vector<1x16xf32>
    %cst_81 = arith.constant dense<0.000000e+00> : vector<1xf32>
    %252 = vector.multi_reduction <add>, %251, %cst_81 [1] : vector<1x16xf32> to vector<1xf32>
    %253 = vector.shape_cast %252 : vector<1xf32> to vector<1x1xf32>
    %254 = math.log %253 : vector<1x1xf32>
    %255 = arith.addf %248, %254 : vector<1x1xf32>
    %c0_i32_82 = arith.constant 0 : i32
    %256 = arith.addi %c0_i32_82, %244 : i32
    %257 = vector.broadcast %256 : i32 to vector<1x16xi32>
    %258 = arith.cmpi eq, %234, %257 : vector<1x16xi32>
    %cst_83 = arith.constant 0.000000e+00 : f32
    %259 = vector.broadcast %cst_83 : f32 to vector<1x16xf32>
    %260 = arith.select %258, %235, %259 : vector<1x16xi1>, vector<1x16xf32>
    %cst_84 = arith.constant dense<0.000000e+00> : vector<1xf32>
    %261 = vector.multi_reduction <add>, %260, %cst_84 [1] : vector<1x16xf32> to vector<1xf32>
    %262 = vector.shape_cast %261 : vector<1xf32> to vector<1x1xf32>
    %263 = arith.subf %255, %262 : vector<1x1xf32>
    %264 = arith.addf %237, %263 : vector<1x1xf32>
    %c0_85 = arith.constant 0 : index
    %265 = memref.load %arg10[%c0_85] : memref<2xi32, #tpu.memory_space<smem>>
    %cst_86 = arith.constant -1.000000e+30 : f32
    %266 = vector.broadcast %cst_86 : f32 to vector<1x16xf32>
    %267 = arith.select %243, %236, %266 : vector<1x16xi1>, vector<1x16xf32>
    %cst_87 = arith.constant dense<0xFF800000> : vector<1xf32>
    %268 = vector.multi_reduction <maximumf>, %267, %cst_87 [1] : vector<1x16xf32> to vector<1xf32>
    %269 = vector.shape_cast %268 : vector<1xf32> to vector<1x1xf32>
    %270 = vector.broadcast %269 : vector<1x1xf32> to vector<1x16xf32>
    %271 = arith.subf %267, %270 : vector<1x16xf32>
    %272 = math.exp %271 : vector<1x16xf32>
    %cst_88 = arith.constant dense<0.000000e+00> : vector<1xf32>
    %273 = vector.multi_reduction <add>, %272, %cst_88 [1] : vector<1x16xf32> to vector<1xf32>
    %274 = vector.shape_cast %273 : vector<1xf32> to vector<1x1xf32>
    %275 = math.log %274 : vector<1x1xf32>
    %276 = arith.addf %269, %275 : vector<1x1xf32>
    %c0_i32_89 = arith.constant 0 : i32
    %277 = arith.addi %c0_i32_89, %265 : i32
    %278 = vector.broadcast %277 : i32 to vector<1x16xi32>
    %279 = arith.cmpi eq, %234, %278 : vector<1x16xi32>
    %cst_90 = arith.constant 0.000000e+00 : f32
    %280 = vector.broadcast %cst_90 : f32 to vector<1x16xf32>
    %281 = arith.select %279, %236, %280 : vector<1x16xi1>, vector<1x16xf32>
    %cst_91 = arith.constant dense<0.000000e+00> : vector<1xf32>
    %282 = vector.multi_reduction <add>, %281, %cst_91 [1] : vector<1x16xf32> to vector<1xf32>
    %283 = vector.shape_cast %282 : vector<1xf32> to vector<1x1xf32>
    %284 = arith.subf %276, %283 : vector<1x1xf32>
    %285 = arith.addf %238, %284 : vector<1x1xf32>
    %c8_i32_92 = arith.constant 8 : i32
    %286 = vector.broadcast %c8_i32_92 : i32 to vector<1x16xi32>
    %287 = arith.cmpi sge, %234, %286 : vector<1x16xi32>
    %c16_i32 = arith.constant 16 : i32
    %288 = vector.broadcast %c16_i32 : i32 to vector<1x16xi32>
    %289 = arith.cmpi slt, %234, %288 : vector<1x16xi32>
    %290 = arith.andi %287, %289 : vector<1x16xi1>
    %c1_93 = arith.constant 1 : index
    %291 = memref.load %arg9[%c1_93] : memref<2xi32, #tpu.memory_space<smem>>
    %cst_94 = arith.constant -1.000000e+30 : f32
    %292 = vector.broadcast %cst_94 : f32 to vector<1x16xf32>
    %293 = arith.select %290, %235, %292 : vector<1x16xi1>, vector<1x16xf32>
    %cst_95 = arith.constant dense<0xFF800000> : vector<1xf32>
    %294 = vector.multi_reduction <maximumf>, %293, %cst_95 [1] : vector<1x16xf32> to vector<1xf32>
    %295 = vector.shape_cast %294 : vector<1xf32> to vector<1x1xf32>
    %296 = vector.broadcast %295 : vector<1x1xf32> to vector<1x16xf32>
    %297 = arith.subf %293, %296 : vector<1x16xf32>
    %298 = math.exp %297 : vector<1x16xf32>
    %cst_96 = arith.constant dense<0.000000e+00> : vector<1xf32>
    %299 = vector.multi_reduction <add>, %298, %cst_96 [1] : vector<1x16xf32> to vector<1xf32>
    %300 = vector.shape_cast %299 : vector<1xf32> to vector<1x1xf32>
    %301 = math.log %300 : vector<1x1xf32>
    %302 = arith.addf %295, %301 : vector<1x1xf32>
    %c8_i32_97 = arith.constant 8 : i32
    %303 = arith.addi %c8_i32_97, %291 : i32
    %304 = vector.broadcast %303 : i32 to vector<1x16xi32>
    %305 = arith.cmpi eq, %234, %304 : vector<1x16xi32>
    %cst_98 = arith.constant 0.000000e+00 : f32
    %306 = vector.broadcast %cst_98 : f32 to vector<1x16xf32>
    %307 = arith.select %305, %235, %306 : vector<1x16xi1>, vector<1x16xf32>
    %cst_99 = arith.constant dense<0.000000e+00> : vector<1xf32>
    %308 = vector.multi_reduction <add>, %307, %cst_99 [1] : vector<1x16xf32> to vector<1xf32>
    %309 = vector.shape_cast %308 : vector<1xf32> to vector<1x1xf32>
    %310 = arith.subf %302, %309 : vector<1x1xf32>
    %311 = arith.addf %264, %310 : vector<1x1xf32>
    %c1_100 = arith.constant 1 : index
    %312 = memref.load %arg10[%c1_100] : memref<2xi32, #tpu.memory_space<smem>>
    %cst_101 = arith.constant -1.000000e+30 : f32
    %313 = vector.broadcast %cst_101 : f32 to vector<1x16xf32>
    %314 = arith.select %290, %236, %313 : vector<1x16xi1>, vector<1x16xf32>
    %cst_102 = arith.constant dense<0xFF800000> : vector<1xf32>
    %315 = vector.multi_reduction <maximumf>, %314, %cst_102 [1] : vector<1x16xf32> to vector<1xf32>
    %316 = vector.shape_cast %315 : vector<1xf32> to vector<1x1xf32>
    %317 = vector.broadcast %316 : vector<1x1xf32> to vector<1x16xf32>
    %318 = arith.subf %314, %317 : vector<1x16xf32>
    %319 = math.exp %318 : vector<1x16xf32>
    %cst_103 = arith.constant dense<0.000000e+00> : vector<1xf32>
    %320 = vector.multi_reduction <add>, %319, %cst_103 [1] : vector<1x16xf32> to vector<1xf32>
    %321 = vector.shape_cast %320 : vector<1xf32> to vector<1x1xf32>
    %322 = math.log %321 : vector<1x1xf32>
    %323 = arith.addf %316, %322 : vector<1x1xf32>
    %c8_i32_104 = arith.constant 8 : i32
    %324 = arith.addi %c8_i32_104, %312 : i32
    %325 = vector.broadcast %324 : i32 to vector<1x16xi32>
    %326 = arith.cmpi eq, %234, %325 : vector<1x16xi32>
    %cst_105 = arith.constant 0.000000e+00 : f32
    %327 = vector.broadcast %cst_105 : f32 to vector<1x16xf32>
    %328 = arith.select %326, %236, %327 : vector<1x16xi1>, vector<1x16xf32>
    %cst_106 = arith.constant dense<0.000000e+00> : vector<1xf32>
    %329 = vector.multi_reduction <add>, %328, %cst_106 [1] : vector<1x16xf32> to vector<1xf32>
    %330 = vector.shape_cast %329 : vector<1xf32> to vector<1x1xf32>
    %331 = arith.subf %323, %330 : vector<1x1xf32>
    %332 = arith.addf %285, %331 : vector<1x1xf32>
    %cst_107 = arith.constant 2.000000e+00 : f32
    %333 = vector.broadcast %cst_107 : f32 to vector<1x1xf32>
    %334 = arith.divf %311, %333 : vector<1x1xf32>
    %cst_108 = arith.constant 2.000000e+00 : f32
    %335 = vector.broadcast %cst_108 : f32 to vector<1x1xf32>
    %336 = arith.divf %332, %335 : vector<1x1xf32>
    %337 = arith.mulf %334, %336 : vector<1x1xf32>
    %338 = math.sqrt %337 : vector<1x1xf32>
    %c0_109 = arith.constant 0 : index
    %c0_110 = arith.constant 0 : index
    %339 = vector.load %arg12[%c0_109, %c0_110] : memref<1x1xf32, #tpu.memory_space<vmem>>, vector<1x1xf32>
    tpu.vector_store %arg12[%c0_109, %c0_110], %338 {strides = array<i32>} : memref<1x1xf32, #tpu.memory_space<vmem>>, vector<1x1xf32>,
    return
  }
  func.func @transform_0(%arg0: i32) -> (i32, i32) {
    %c0_i32 = arith.constant 0 : i32
    %c0_i32_0 = arith.constant 0 : i32
    %c0_i32_1 = arith.constant 0 : i32
    return %c0_i32, %c0_i32_0 : i32, i32
  }
  func.func @transform_1(%arg0: i32) -> (i32, i32) {
    %c0_i32 = arith.constant 0 : i32
    %c0_i32_0 = arith.constant 0 : i32
    %c0_i32_1 = arith.constant 0 : i32
    return %c0_i32, %c0_i32_0 : i32, i32
  }
  func.func @transform_2(%arg0: i32) -> (i32, i32, i32) {
    %c0_i32 = arith.constant 0 : i32
    %c0_i32_0 = arith.constant 0 : i32
    %c0_i32_1 = arith.constant 0 : i32
    %c0_i32_2 = arith.constant 0 : i32
    return %c0_i32, %c0_i32_0, %c0_i32_1 : i32, i32, i32
  }
  func.func @transform_3(%arg0: i32) -> (i32, i32, i32) {
    %c0_i32 = arith.constant 0 : i32
    %c0_i32_0 = arith.constant 0 : i32
    %c0_i32_1 = arith.constant 0 : i32
    %c0_i32_2 = arith.constant 0 : i32
    return %c0_i32, %c0_i32_0, %c0_i32_1 : i32, i32, i32
  }
  func.func @transform_4(%arg0: i32) -> (i32, i32, i32) {
    %c0_i32 = arith.constant 0 : i32
    %c0_i32_0 = arith.constant 0 : i32
    %c0_i32_1 = arith.constant 0 : i32
    %c0_i32_2 = arith.constant 0 : i32
    return %c0_i32, %c0_i32_0, %c0_i32_1 : i32, i32, i32
  }
  func.func @transform_5(%arg0: i32) -> (i32, i32, i32) {
    %c0_i32 = arith.constant 0 : i32
    %c0_i32_0 = arith.constant 0 : i32
    %c0_i32_1 = arith.constant 0 : i32
    %c0_i32_2 = arith.constant 0 : i32
    return %c0_i32, %c0_i32_0, %c0_i32_1 : i32, i32, i32
  }
  func.func @transform_6(%arg0: i32) -> (i32, i32) {
    %c0_i32 = arith.constant 0 : i32
    %c0_i32_0 = arith.constant 0 : i32
    %c0_i32_1 = arith.constant 0 : i32
    return %c0_i32, %c0_i32_0 : i32, i32
  }
  func.func @transform_7(%arg0: i32) -> (i32, i32) {
    %c0_i32 = arith.constant 0 : i32
    %c0_i32_0 = arith.constant 0 : i32
    %c0_i32_1 = arith.constant 0 : i32
    return %c0_i32, %c0_i32_0 : i32, i32
  }
  func.func @transform_8(%arg0: i32) -> i32 {
    %c0_i32 = arith.constant 0 : i32
    %c0_i32_0 = arith.constant 0 : i32
    return %c0_i32 : i32
  }
  func.func @transform_9(%arg0: i32) -> i32 {
    %c0_i32 = arith.constant 0 : i32
    %c0_i32_0 = arith.constant 0 : i32
    return %c0_i32 : i32
  }
  func.func @transform_10(%arg0: i32) -> (i32, i32) {
    %c0_i32 = arith.constant 0 : i32
    %c0_i32_0 = arith.constant 0 : i32
    %c0_i32_1 = arith.constant 0 : i32
    return %c0_i32, %c0_i32_0 : i32, i32
  }
  func.func @transform_11(%arg0: i32) -> (i32, i32) {
    %c0_i32 = arith.constant 0 : i32
    %c0_i32_0 = arith.constant 0 : i32
    %c0_i32_1 = arith.constant 0 : i32
    return %c0_i32, %c0_i32_0 : i32, i32
  }
}

</mosaic_0001>

<bundles_post_ra>
// kernel: tpu_custom_call.1
= control target key start
LH: loop header
LB: loop body
LE: loop exit
PB: predicated region body
PF: predicated region fallthrough
CT: control target
= control target key end

     0   :  { %17 = vsyncpa [#allocation3], 0  ;;  %s2099_s0 = inlined_call_operand.hbm [shape: f32[16,32], index: 0, kind: input, shape index: {}]   ;;  %s2100_s1 = inlined_call_operand.hbm [shape: f32[16,16], index: 1, kind: input, shape index: {}]   ;;  %s2101_s2 = inlined_call_operand.hbm [shape: bf16[2,32,96], index: 2, kind: input, shape index: {}]   ;;  %s2102_s3 = inlined_call_operand.hbm [shape: bf16[2,32,32], index: 3, kind: input, shape index: {}]   ;;  %s2103_s4 = inlined_call_operand.hbm [shape: bf16[2,32,128], index: 4, kind: input, shape index: {}]   ;;  %s2104_s5 = inlined_call_operand.hbm [shape: f32[2,8,96], index: 5, kind: input, shape index: {}]   ;;  %s2105_s6 = inlined_call_operand.vmem [shape: f32[2,32], index: 6, kind: input, shape index: {}]   ;;  %s2106_s7 = inlined_call_operand.vmem [shape: f32[2,1], index: 7, kind: input, shape index: {}]   ;;  %s2107_s8 = inlined_call_operand.vmem [shape: s32[2], index: 8, kind: input, shape index: {}]   ;;  %s2108_s9 = inlined_call_operand.vmem [shape: s32[2], index: 9, kind: input, shape index: {}]   ;;  %s2109_s10 = inlined_call_operand.hbm [shape: f32[2,16], index: 10, kind: output, shape index: {0}]   ;;  %s2110_s11 = inlined_call_operand.hbm [shape: f32[1,1], index: 11, kind: output, shape index: {1}]  }
   0x1   :  { %18 = vsyncpa [#allocation7], 0 }
   0x2   :  { %19 = vsyncpa [#allocation10], 0 }
   0x3   :  { %20 = vsyncpa [#allocation13], 0 }
   0x4   :  { %21 = vsyncpa [#allocation5], 0 }
   0x5   :  { %22 = vsyncpa [#allocation16], 0 }
   0x6   :  { %23 = vsyncpa [#allocation4], 0 }
   0x7   :  { %24 = vsyncpa [#allocation19], 0  ;;  %s1756_s17 = smov [#allocation6]  }
   0x8   :  { %s42_s18 = sshll.u32 %s1756_s17, 4  ;;  %s43_s18 = int_to_ptr.vmem [resolvable:$true] %s42_s18 }
   0x9   :  { %s1564_s19 = scalar_lea.vmem %s43_s18, 256  ;;  %p1569_p1 = scmp.lt.s32.totalorder %s43_s18, %s43_s18 }
   0xa   :  { %p1565_p0 = scmp.ne.s32.totalorder %s43_s18, %s1564_s19  ;;  %p1570_p2 = scmp.lt.s32.totalorder %s1564_s19, %s1564_s19 }
   0xc   :  { %p1571_p3 = por %p1570_p2, %p1569_p1 }
   0xe   :  { %p1572_p4 = pnand %p1571_p3, %p1565_p0 }
  0x10   :  { %1575 = shalt.err (!%p1572_p4)
}
  0x11   :  { %s1757_s20 = smov 128   ;;  %s1758_s21 = smov 8  }
  0x12   :  { %48 = dma.hbm_to_vmem [thread:$0]  %s2100_s1, 256, %s43_s18, [#allocation7], %s1757_s20, %s1757_s20, %s1758_s21  }
  0x13   :  { %s1759_s24 = smov [#allocation9]   ;;  %s1760_s26 = smov [#allocation2]  }
  0x14   :  { %s66_s25 = sshll.u32 %s1759_s24, 4  ;;  %s30_s27 = sshll.u32 %s1760_s26, 4  ;;  %s67_s25 = int_to_ptr.vmem [resolvable:$true] %s66_s25  ;;  %s31_s27 = int_to_ptr.vmem [resolvable:$true] %s30_s27 }
  0x15   :  { %s1584_s28 = scalar_lea.vmem %s67_s25, 512  ;;  %p1589_p6 = scmp.lt.s32.totalorder %s67_s25, %s67_s25 }
  0x16   :  { %p1585_p5 = scmp.ne.s32.totalorder %s67_s25, %s1584_s28  ;;  %p1590_p7 = scmp.lt.s32.totalorder %s1584_s28, %s1584_s28 }
  0x18   :  { %p1591_p8 = por %p1590_p7, %p1589_p6 }
  0x1a   :  { %p1592_p9 = pnand %p1591_p8, %p1585_p5 }
  0x1c   :  { %1595 = shalt.err (!%p1592_p9)
}
  0x1d   :  { %s1761_s29 = smov 64   ;;  %s1762_s30 = smov 4  }
  0x1e   :  { %72 = dma.hbm_to_vmem [thread:$0]  %s2102_s3, 512, %s67_s25, [#allocation10], %s1761_s29, %s1761_s29, %s1762_s30  }
  0x1f   :  { %s1604_s1 = scalar_lea.vmem %s31_s27, 256  ;;  %p1609_p11 = scmp.lt.s32.totalorder %s31_s27, %s31_s27 }
  0x20   :  { %p1605_p10 = scmp.ne.s32.totalorder %s31_s27, %s1604_s1  ;;  %p1610_p12 = scmp.lt.s32.totalorder %s1604_s1, %s1604_s1 }
  0x22   :  { %p1611_p13 = por %p1610_p12, %p1609_p11 }
  0x24   :  { %p1612_p0 = pnand %p1611_p13, %p1605_p10 }
  0x26   :  { %1615 = shalt.err (!%p1612_p0)
}
  0x27   :  { %36 = dma.hbm_to_vmem [thread:$0]  %s2099_s0, 256, %s31_s27, [#allocation3], %s1757_s20, %s1757_s20, %s1758_s21  }
  0x28   :  { %s1763_s16 = smov [#allocation8]   ;;  %s1764_s18 = smov [#allocation11]  }
  0x29   :  { %s54_s17 = sshll.u32 %s1763_s16, 4  ;;  %s78_s3 = sshll.u32 %s1764_s18, 4  ;;  %s55_s17 = int_to_ptr.vmem [resolvable:$true] %s54_s17  ;;  %s79_s3 = int_to_ptr.vmem [resolvable:$true] %s78_s3 }
  0x2a   :  { %s1624_s19 = scalar_lea.vmem %s55_s17, 512  ;;  %p1629_p2 = scmp.lt.s32.totalorder %s55_s17, %s55_s17 }
  0x2b   :  { %p1625_p1 = scmp.ne.s32.totalorder %s55_s17, %s1624_s19  ;;  %p1630_p3 = scmp.lt.s32.totalorder %s1624_s19, %s1624_s19 }
  0x2d   :  { %p1631_p4 = por %p1630_p3, %p1629_p2 }
  0x2f   :  { %p1632_p5 = pnand %p1631_p4, %p1625_p1 }
  0x31   :  { %1635 = shalt.err (!%p1632_p5)
}
  0x32   :  { %60 = dma.hbm_to_vmem [thread:$0]  %s2101_s2, 512, %s55_s17, [#allocation7], %s1761_s29, %s1761_s29, %s1762_s30  }
  0x33   :  { %s1644_s0 = scalar_lea.vmem %s79_s3, 512  ;;  %p1649_p7 = scmp.lt.s32.totalorder %s79_s3, %s79_s3 }
  0x34   :  { %p1645_p6 = scmp.ne.s32.totalorder %s79_s3, %s1644_s0  ;;  %p1650_p8 = scmp.lt.s32.totalorder %s1644_s0, %s1644_s0 }
  0x36   :  { %p1651_p9 = por %p1650_p8, %p1649_p7 }
  0x38   :  { %p1652_p10 = pnand %p1651_p9, %p1645_p6 }
  0x3a   :  { %1655 = shalt.err (!%p1652_p10)
}
  0x3b   :  { %84 = dma.hbm_to_vmem [thread:$0]  %s2103_s4, 512, %s79_s3, [#allocation10], %s1761_s29, %s1761_s29, %s1762_s30  }
  0x3c   :  { %s1765_s26 = smov [#allocation12]   ;;  %s107_s2 = sshll.u32 %s2107_s8, 4  ;;  %s108_s2 = int_to_ptr.vmem [resolvable:$true] %s107_s2 }
  0x3d   :  { %s90_s27 = sshll.u32 %s1765_s26, 4  ;;  %s91_s27 = int_to_ptr.vmem [resolvable:$true] %s90_s27 }
  0x3e   :  { %s1664_s13 = scalar_lea.vmem %s91_s27, 256  ;;  %p1669_p12 = scmp.lt.s32.totalorder %s91_s27, %s91_s27 }
  0x3f   :  { %p1665_p11 = scmp.ne.s32.totalorder %s91_s27, %s1664_s13  ;;  %p1670_p13 = scmp.lt.s32.totalorder %s1664_s13, %s1664_s13 }
  0x41   :  { %p1671_p0 = por %p1670_p13, %p1669_p12 }
  0x43   :  { %p1672_p1 = pnand %p1671_p0, %p1665_p11 }
  0x45   :  { %1675 = shalt.err (!%p1672_p1)
}
  0x46   :  { %96 = dma.hbm_to_vmem [thread:$0]  %s2104_s5, 256, %s91_s27, [#allocation13], %s1757_s20, %s1757_s20, %s1758_s21  }
  0x47   :  { %s117_s8 = sshll.u32 %s2108_s9, 4  ;;  %s1676_s15 = scalar_lea.vmem %s108_s2, 16  ;;  %s118_s8 = int_to_ptr.vmem [resolvable:$true] %s117_s8 }
  0x48   :  { %p1677_p2 = scmp.ne.s32.totalorder %s108_s2, %s1676_s15  ;;  %p1681_p3 = scmp.lt.s32.totalorder %s108_s2, %s108_s2 }
  0x49   :  { %p1682_p4 = scmp.lt.s32.totalorder %s1676_s15, %s1676_s15 }
  0x4b   :  { %p1683_p5 = por %p1682_p4, %p1681_p3 }
  0x4d   :  { %p1684_p6 = pnand %p1683_p5, %p1677_p2 }
  0x4f   :  { %1687 = shalt.err (!%p1684_p6)
}
  0x50   :  { %s1766_s16 = smov [#allocation14]   ;;  %s1688_s17 = scalar_lea.vmem %s118_s8, 16 }
  0x51   :  { %110 = dma.vmem_to_smem %s108_s2, 16, %s1766_s16, [#allocation5]  }
  0x52   :  { %p1689_p7 = scmp.ne.s32.totalorder %s118_s8, %s1688_s17  ;;  %p1693_p8 = scmp.lt.s32.totalorder %s118_s8, %s118_s8 }
  0x53   :  { %p1694_p9 = scmp.lt.s32.totalorder %s1688_s17, %s1688_s17 }
  0x55   :  { %p1695_p10 = por %p1694_p9, %p1693_p8 }
  0x57   :  { %p1696_p11 = pnand %p1695_p10, %p1689_p7 }
  0x59   :  { %1699 = shalt.err (!%p1696_p11)
}
  0x5a   :  { %s1767_s5 = smov [#allocation15]  }
  0x5b   :  { %120 = dma.vmem_to_smem %s118_s8, 16, %s1767_s5, [#allocation16]  }
  0x5c   :  { %1740 = dma.done.wait [#allocation3], 256  }
  0x5d   :  { %1741 = vsyncadd [#allocation3], 4294967040 }
  0x5e   :  { %1742 = dma.done.wait [#allocation7], 768  }
  0x5f   :  { %1743 = vsyncadd [#allocation7], 4294966528 }
  0x60   :  { %1744 = dma.done.wait [#allocation10], 1024  }
  0x61   :  { %1745 = vsyncadd [#allocation10], 4294966272 }
  0x62   :  { %1746 = dma.done.wait [#allocation13], 256  }
  0x63   :  { %1747 = vsyncadd [#allocation13], 4294967040 }
  0x64   :  { %1748 = dma.done.wait [#allocation5], 16  }
  0x65   :  { %1749 = vsyncadd [#allocation5], 4294967280 }
  0x66   :  { %1750 = dma.done.wait [#allocation16], 16  }
  0x67   :  { %1751 = vsyncadd [#allocation16], 4294967280 }
  0x68   :  { %145 = sfence }
  0x69   :  { %v1486_v0 = vld [vmem:[#allocation8 + $0x8] sm:$0xff]   ;;  %v1768_v1 = vmov 0.0   ;;  %v1487_v2 = vld [vmem:[#allocation8] sm:$0xff]   ;;  %vm1769_vm0 = vmmov 0   ;;  %vm173_vm1 = vcmask 261120   ;;  %v157_v6 = vlaneseq  ;;  %s1770_s9 = smov 96  }
  0x6a   :  { %1373 = vmatprep.subr.bf16.mxu0 %v1768_v1  ;;  %1381 = vmatprep.subr.bf16.mxu1 %v1768_v1  ;;  %v1880_v3 = vld [vmem:[#allocation2] sm:$0xff]  ;;  %v1882_v4 = vld [vmem:[#allocation2 + $0x8] sm:$0xff]  ;;  %v1908_v20 = vld [vmem:[#allocation6] sm:$0xff]  ;;  %vm269_vm2 = vcmask 130048   ;;  %vm538_vm3 = vcmask 523264   ;;  %s1337_s18 = sld [smem:[#allocation14 + $0x1]] }
  0x6b   :  { %1374 = vmatpush3.bf16.msra.mxu0 %v1486_v0  ;;  %1377 = vmatprep.mubr.msk.bf16.mxu0 %vm1769_vm0, %v1768_v1  ;;  %v152_v5 = vpack.c.bf16 %v1882_v4, %v1880_v3  ;;  %v1894_v7 = vshrl.u32 %v157_v6, 7  ;;  %v1897_v9 = vld [vmem:[#allocation12] sm:$0xff]  ;;  %v1911_v24 = vld [vmem:[#allocation6 + $0x8] sm:$0xff]  ;;  %v1488_v48 = vld [vmem:[#allocation9 + $0x8] sm:$0xff]   ;;  %s1338_s3 = sld [smem:[#allocation15 + $0x1]]  ;;  %vm1162_vm9 = vcmask 123904  }
  0x6c   :  { %1375 = vmatprep.subr.bf16.mxu0 %v1768_v1  ;;  %1383 = vmatprep.mubr.msk.bf16.mxu1 %vm1769_vm0, %v1768_v1  ;;  %v1489_v49 = vld [vmem:[#allocation9] sm:$0xff]   ;;  %s1192_s19 = sld [smem:[#allocation15]]  ;;  %vm1193_vm10 = vcmask 123905   ;;  %vm1171_vm11 = vcmask 122880  }
  0x6d   :  { %v159_v8 = vsub.s32 0, %v1894_v7  ;;  %v347_v55 = vsub.s32 1, %v1894_v7  ;;  %s1169_s22 = sld [smem:[#allocation14]] }
  0x6f   :  { %1376 = vmatpush3.bf16.msra.mxu0 %v1487_v2  ;;  %v160_v11 = vrot.slane %v1897_v9, %v159_v8  ;;  %v348_v56 = vrot.slane %v1897_v9, %v347_v55 }
  0x70   :  { %1387 = vmatprep.subr.bf16.mxu0 %v1768_v1  ;;  %s1231_s23 = sadd.s32 8, %s1337_s18 }
  0x71   :  { %s1253_s0 = sadd.s32 8, %s1338_s3 }
  0x72   :  { %1378 = vmatmul.mubr.msk.bf16.vlgmr.msra.gmra.mxu0 %vm173_vm1, %v152_v5 }
  0x73   :  { %1389 = vmatprep.mubr.msk.bf16.mxu0 %vm1769_vm0, %v1768_v1 }
 0x132   :  { %v211_v10 = vpop.f32.mrf.mxu0 }
 0x133   :  { %v212_v14 = vadd.f32 %v211_v10, %v160_v11 }
 0x134   :  { %v1379_v12 = vpop.f32.mrf.mxu0 }
 0x136   :  { %v214_v13 = vpop.f32.mrf.mxu0 }
 0x137   :  { %v215_v15 = vadd.f32 %v214_v13, %v160_v11 }
 0x138   :  { %v1380_v16 = vpop.f32.mrf.mxu0 }
 0x139   :  { %v218_v17 = vpack.c.bf16 %v215_v15, %v212_v14 }
 0x13b   :  { %220 = vrot.lane.b32.xlu0 %v218_v17, %s1770_s9 }
 0x1ad   :  { %v221_v18 = vpop.permute.xlu0 %220 }
 0x1ae   :  { %v226_v19 = vsel %vm173_vm1, %v221_v18, 0 }
 0x1af   :  { %1382 = vmatpush3.bf16.xpose.msra.mxu1 %v226_v19  ;;  %v1490_v19 = vld [vmem:[#allocation11 + $0x8] sm:$0xff]  }
 0x1b0   :  { %1393 = vmatprep.subr.bf16.mxu1 %v1768_v1 }
 0x1b6   :  { %1384 = vmatmul.mubr.msk.bf16.vlgmr.msra.gmra.mxu1 %vm173_vm1, %v218_v17 }
 0x1b7   :  { %1397 = vmatprep.mubr.msk.bf16.mxu1 %vm1769_vm0, %v1768_v1  ;;  %1394 = vmatpush3.bf16.msra.mxu1 %v1488_v48 }
 0x1b8   :  { %1395 = vmatprep.subr.bf16.mxu1 %v1768_v1 }
 0x1bb   :  { %1396 = vmatpush3.bf16.msra.mxu1 %v1489_v49 }
 0x1bc   :  { %1409 = vmatprep.subr.bf16.mxu1 %v1768_v1 }
 0x276   :  { %v262_v21 = vpop.f32.mrf.mxu1 }
 0x277   :  { %v263_v22 = vadd.f32 %v262_v21, %v1908_v20  ;;  %v1491_v21 = vld [vmem:[#allocation11] sm:$0xff]  }
 0x278   :  { %v1385_v23 = vpop.f32.mrf.mxu1 }
 0x279   :  { %v270_v25 = vsel %vm269_vm2, %v263_v22, -inf }
 0x27a   :  { %271 = vmax.xlane.f32.xlu0 %v270_v25  ;;  %v265_v26 = vpop.f32.mrf.mxu1 }
 0x27b   :  { %v266_v27 = vadd.f32 %v265_v26, %v1911_v24 }
 0x27c   :  { %v1386_v28 = vpop.f32.mrf.mxu1 }
 0x27d   :  { %v273_v29 = vsel %vm269_vm2, %v266_v27, -inf  ;;  %v436_v28 = vsub.s32 2, %v1894_v7 }
 0x27e   :  { %274 = vmax.xlane.f32.xlu1 %v273_v29 }
 0x303   :  { %v272_v30 = vpop.xlane.xlu0 %271 }
 0x304   :  { %v276_v31 = vsub.f32 %v263_v22, %v272_v30 }
 0x306   :  { %v278_v32 = vmul.f32 1.442695, %v276_v31  ;;  %v437_v31 = vrot.slane %v1897_v9, %v436_v28 }
 0x307   :  { %v275_v33 = vpop.xlane.xlu1 %274 }
 0x308   :  { %1498 = vpow2.f32 %v278_v32  ;;  %v277_v34 = vsub.f32 %v266_v27, %v275_v33  ;;  %v442_v32 = vsub.s32 3, %v1894_v7 }
 0x30a   :  { %v280_v35 = vmul.f32 1.442695, %v277_v34 }
 0x30c   :  { %1500 = vpow2.f32 %v280_v35 }
 0x315   :  { %v1499_v36 = vpop.eup %1498 }
 0x316   :  { %v282_v37 = vsel %vm269_vm2, %v1499_v36, 0.0 }
 0x317   :  { %283 = vadd.xlane.f32.xlu1 %v282_v37 }
 0x319   :  { %v1501_v38 = vpop.eup %1500 }
 0x31a   :  { %v285_v39 = vsel %vm269_vm2, %v1501_v38, 0.0 }
 0x31b   :  { %286 = vadd.xlane.f32.xlu1 %v285_v39 }
 0x32c   :  { %293 = vrot.lane.b32.xlu1 %v218_v17, %s1761_s29 }
 0x3a0   :  { %v284_v40 = vpop.xlane.xlu1 %283 }
 0x3a1   :  { %1502 = vrcp.f32 %v284_v40 }
 0x3a4   :  { %v287_v41 = vpop.xlane.xlu1 %286 }
 0x3a5   :  { %1504 = vrcp.f32 %v287_v41 }
 0x3a8   :  { %v294_v42 = vpop.permute.xlu1 %293 }
 0x3a9   :  { %1388 = vmatpush3.bf16.msra.mxu0 %v294_v42 }
 0x3aa   :  { %1401 = vmatprep.subr.bf16.mxu0 %v1768_v1 }
 0x3ae   :  { %v1503_v43 = vpop.eup %1502 }
 0x3af   :  { %v289_v45 = vmul.f32 %v1503_v43, %v1499_v36  ;;  %v443_v36 = vrot.slane %v1897_v9, %v442_v32 }
 0x3b2   :  { %v1505_v44 = vpop.eup %1504 }
 0x3b3   :  { %v291_v46 = vmul.f32 %v1505_v44, %v1501_v38 }
 0x3b5   :  { %v292_v47 = vpack.c.bf16 %v291_v46, %v289_v45  ;;  %v453_v45 = vsub.s32 4, %v1894_v7 }
 0x3b7   :  { %1390 = vmatmul.mubr.msk.bf16.vlgmr.msra.gmra.mxu0 %vm269_vm2, %v292_v47  ;;  %v454_v46 = vrot.slane %v1897_v9, %v453_v45 }
 0x3b8   :  { %1405 = vmatprep.mubr.msk.bf16.mxu0 %vm1769_vm0, %v1768_v1  ;;  %1402 = vmatpush3.bf16.msra.mxu0 %v1490_v19 }
 0x3b9   :  { %1403 = vmatprep.subr.bf16.mxu0 %v1768_v1 }
 0x3bc   :  { %1404 = vmatpush3.bf16.msra.mxu0 %v1491_v21 }
 0x3bd   :  { %1417 = vmatprep.subr.bf16.mxu0 %v1768_v1 }
 0x477   :  { %v333_v50 = vpop.f32.mrf.mxu0 }
 0x479   :  { %v1391_v51 = vpop.f32.mrf.mxu0 }
 0x47b   :  { %v336_v52 = vpop.f32.mrf.mxu0 }
 0x47c   :  { %v340_v53 = vpack.c.bf16 %v336_v52, %v333_v50 }
 0x47d   :  { %v1392_v54 = vpop.f32.mrf.mxu0 }
 0x47e   :  { %1398 = vmatmul.mubr.msk.bf16.vlgmr.msra.gmra.mxu1 %vm173_vm1, %v340_v53 }
 0x47f   :  { %1413 = vmatprep.mubr.msk.bf16.mxu1 %vm1769_vm0, %v1768_v1 }
 0x53e   :  { %v398_v57 = vpop.f32.mrf.mxu1 }
 0x53f   :  { %v399_v58 = vadd.f32 %v398_v57, %v348_v56 }
 0x540   :  { %v1399_v59 = vpop.f32.mrf.mxu1 }
 0x541   :  { %v405_v60 = vadd.f32 %v399_v58, %v1880_v3 }
 0x542   :  { %v401_v61 = vpop.f32.mrf.mxu1 }
 0x543   :  { %v402_v62 = vadd.f32 %v401_v61, %v348_v56  ;;  %v407_v63 = vsel %vm173_vm1, %v405_v60, 0.0 }
 0x544   :  { %408 = vadd.xlane.f32.xlu1 %v407_v63  ;;  %v1400_v0 = vpop.f32.mrf.mxu1 }
 0x545   :  { %v406_v2 = vadd.f32 %v402_v62, %v1882_v4 }
 0x547   :  { %v410_v5 = vsel %vm173_vm1, %v406_v2, 0.0 }
 0x548   :  { %411 = vadd.xlane.f32.xlu0 %v410_v5 }
 0x555   :  { %534 = vrot.lane.b32.xlu1 %v1491_v21, %s1761_s29 }
 0x5cd   :  { %v409_v10 = vpop.xlane.xlu1 %408 }
 0x5ce   :  { %v414_v11 = vmul.f32 0.03125, %v409_v10 }
 0x5d0   :  { %v416_v12 = vsub.f32 %v405_v60, %v414_v11 }
 0x5d1   :  { %v412_v13 = vpop.xlane.xlu0 %411  ;;  %v535_v43 = vpop.permute.xlu1 %534 }
 0x5d2   :  { %v415_v14 = vmul.f32 0.03125, %v412_v13  ;;  %v418_v15 = vmul.f32 %v416_v12, %v416_v12  ;;  %v543_v44 = vsel %vm538_vm3, %v535_v43, 0 }
 0x5d4   :  { %v417_v16 = vsub.f32 %v406_v2, %v415_v14  ;;  %v420_v3 = vsel %vm173_vm1, %v418_v15, 0.0 }
 0x5d5   :  { %421 = vadd.xlane.f32.xlu0 %v420_v3 }
 0x5d6   :  { %v419_v17 = vmul.f32 %v417_v16, %v417_v16 }
 0x5d8   :  { %v423_v18 = vsel %vm173_vm1, %v419_v17, 0.0 }
 0x5d9   :  { %424 = vadd.xlane.f32.xlu0 %v423_v18 }
 0x5ef   :  { %536 = vrot.lane.b32.xlu0 %v1490_v19, %s1761_s29 }
 0x65e   :  { %v422_v4 = vpop.xlane.xlu0 %421 }
 0x65f   :  { %v426_v22 = vmul.f32 0.03125, %v422_v4 }
 0x661   :  { %v428_v23 = vadd.f32 1e-05, %v426_v22 }
 0x662   :  { %v425_v25 = vpop.xlane.xlu0 %424 }
 0x663   :  { %1506 = vrsqrt.f32 %v428_v23  ;;  %v427_v26 = vmul.f32 0.03125, %v425_v25 }
 0x665   :  { %v429_v27 = vadd.f32 1e-05, %v427_v26 }
 0x666   :  { %v537_v41 = vpop.permute.xlu0 %536 }
 0x667   :  { %1508 = vrsqrt.f32 %v429_v27  ;;  %v546_v42 = vsel %vm538_vm3, %v537_v41, 0  ;;  %v1492_v41 = vld [vmem:[#allocation8 + $0x18] sm:$0xff]  }
 0x668   :  { %1410 = vmatpush3.bf16.xpose.msra.mxu1 %v546_v42 }
 0x669   :  { %1411 = vmatprep.subr.bf16.mxu1 %v1768_v1 }
 0x670   :  { %v1507_v29 = vpop.eup %1506  ;;  %1412 = vmatpush3.bf16.xpose.msra.mxu1 %v543_v44 }
 0x671   :  { %v432_v30 = vmul.f32 %v1507_v29, %v416_v12  ;;  %1431 = vmatprep.subr.bf16.mxu1 %v1768_v1 }
 0x673   :  { %v438_v35 = vmul.f32 %v437_v31, %v432_v30 }
 0x674   :  { %v1509_v33 = vpop.eup %1508 }
 0x675   :  { %v433_v34 = vmul.f32 %v1509_v33, %v417_v16  ;;  %v444_v38 = vadd.f32 %v443_v36, %v438_v35  ;;  %v532_v16 = vsub.s32 5, %v1894_v7 }
 0x677   :  { %v439_v37 = vmul.f32 %v437_v31, %v433_v34  ;;  %v533_v3 = vrot.slane %v1897_v9, %v532_v16 }
 0x679   :  { %v445_v39 = vadd.f32 %v443_v36, %v439_v37 }
 0x67b   :  { %v450_v40 = vpack.c.bf16 %v445_v39, %v444_v38 }
 0x67d   :  { %1406 = vmatmul.mubr.msk.bf16.vlgmr.msra.gmra.mxu0 %vm173_vm1, %v450_v40 }
 0x67e   :  { %1421 = vmatprep.mubr.msk.bf16.mxu0 %vm1769_vm0, %v1768_v1  ;;  %1418 = vmatpush3.bf16.msra.mxu0 %v1492_v41 }
 0x67f   :  { %1419 = vmatprep.subr.bf16.mxu0 %v1768_v1 }
 0x73d   :  { %v504_v47 = vpop.f32.mrf.mxu0 }
 0x73e   :  { %v505_v48 = vadd.f32 %v504_v47, %v454_v46 }
 0x73f   :  { %v1407_v49 = vpop.f32.mrf.mxu0 }
 0x740   :  { %v511_v50 = vmul.f32 %v505_v48, %v505_v48  ;;  %v619_v49 = vsub.s32 6, %v1894_v7 }
 0x741   :  { %v507_v51 = vpop.f32.mrf.mxu0 }
 0x742   :  { %v513_v52 = vmul.f32 %v511_v50, %v505_v48  ;;  %v508_v53 = vadd.f32 %v507_v51, %v454_v46 }
 0x743   :  { %v1408_v54 = vpop.f32.mrf.mxu0 }
 0x744   :  { %v515_v56 = vmul.f32 0.044715, %v513_v52  ;;  %v512_v57 = vmul.f32 %v508_v53, %v508_v53  ;;  %v620_v52 = vrot.slane %v1897_v9, %v619_v49 }
 0x746   :  { %v517_v58 = vadd.f32 %v515_v56, %v505_v48  ;;  %v514_v59 = vmul.f32 %v512_v57, %v508_v53 }
 0x748   :  { %v519_v60 = vmul.f32 0.7978846, %v517_v58  ;;  %v516_v61 = vmul.f32 0.044715, %v514_v59 }
 0x74a   :  { %1510 = vtanh.f32 %v519_v60  ;;  %v518_v62 = vadd.f32 %v516_v61, %v508_v53 }
 0x74c   :  { %v520_v63 = vmul.f32 0.7978846, %v518_v62 }
 0x74e   :  { %1512 = vtanh.f32 %v520_v63  ;;  %v1991_v63 = vld [vmem:[#allocation12 + $0x8] sm:$0xff] }
 0x757   :  { %v1511_v0 = vpop.eup %1510 }
 0x758   :  { %v523_v2 = vadd.f32 1.0, %v1511_v0 }
 0x75a   :  { %v525_v10 = vmul.f32 0.5, %v523_v2 }
 0x75b   :  { %v1513_v5 = vpop.eup %1512 }
 0x75c   :  { %v524_v11 = vadd.f32 1.0, %v1513_v5  ;;  %v527_v13 = vmul.f32 %v525_v10, %v505_v48 }
 0x75e   :  { %v526_v12 = vmul.f32 0.5, %v524_v11 }
 0x760   :  { %v528_v14 = vmul.f32 %v526_v12, %v508_v53  ;;  %v625_v53 = vsub.s32 7, %v1894_v7  ;;  %v1165_v7 = vand.u32 127, %v157_v6 }
 0x762   :  { %v529_v15 = vpack.c.bf16 %v528_v14, %v527_v13  ;;  %v626_v58 = vrot.slane %v1897_v9, %v625_v53  ;;  %v640_v9 = vrot.slane %v1991_v63, %v159_v8  ;;  %vm1214_vm4 = vcmp.ge.s32.totalorder %v1165_v7, 8 }
 0x763   :  { %vm1215_vm5 = vcmp.lt.s32.totalorder %v1165_v7, 16  ;;  %vm1167_vm6 = vcmp.lt.s32.totalorder %v1165_v7, 8 }
 0x764   :  { %1414 = vmatmul.mubr.msk.bf16.vlgmr.msra.gmra.mxu1 %vm538_vm3, %v529_v15  ;;  %vm1216_vm12 = vmand %vm1214_vm4, %vm1215_vm5 }
 0x765   :  { %1433 = vmatprep.mubr.msk.bf16.mxu1 %vm1769_vm0, %v1768_v1 }
 0x824   :  { %v582_v17 = vpop.f32.mrf.mxu1 }
 0x825   :  { %v583_v18 = vadd.f32 %v582_v17, %v533_v3 }
 0x826   :  { %v1415_v19 = vpop.f32.mrf.mxu1 }
 0x827   :  { %v589_v21 = vadd.f32 %v583_v18, %v444_v38 }
 0x828   :  { %v585_v4 = vpop.f32.mrf.mxu1 }
 0x829   :  { %v586_v22 = vadd.f32 %v585_v4, %v533_v3  ;;  %v591_v23 = vsel %vm173_vm1, %v589_v21, 0.0 }
 0x82a   :  { %592 = vadd.xlane.f32.xlu0 %v591_v23  ;;  %v1416_v25 = vpop.f32.mrf.mxu1 }
 0x82b   :  { %v590_v26 = vadd.f32 %v586_v22, %v445_v39  ;;  %v1493_v39 = vld [vmem:[#allocation8 + $0x10] sm:$0xff]  }
 0x82c   :  { %1420 = vmatpush3.bf16.msra.mxu0 %v1493_v39 }
 0x82d   :  { %v594_v27 = vsel %vm173_vm1, %v590_v26, 0.0  ;;  %1425 = vmatprep.subr.bf16.mxu0 %v1768_v1 }
 0x82e   :  { %595 = vadd.xlane.f32.xlu1 %v594_v27 }
 0x8b3   :  { %v593_v29 = vpop.xlane.xlu0 %592 }
 0x8b4   :  { %v597_v30 = vmul.f32 0.03125, %v593_v29 }
 0x8b6   :  { %v599_v31 = vsub.f32 %v589_v21, %v597_v30 }
 0x8b7   :  { %v596_v33 = vpop.xlane.xlu1 %595 }
 0x8b8   :  { %v598_v34 = vmul.f32 0.03125, %v596_v33  ;;  %v601_v35 = vmul.f32 %v599_v31, %v599_v31 }
 0x8ba   :  { %v600_v36 = vsub.f32 %v590_v26, %v598_v34  ;;  %v603_v37 = vsel %vm173_vm1, %v601_v35, 0.0 }
 0x8bb   :  { %604 = vadd.xlane.f32.xlu0 %v603_v37 }
 0x8bc   :  { %v602_v38 = vmul.f32 %v600_v36, %v600_v36 }
 0x8be   :  { %v606_v40 = vsel %vm173_vm1, %v602_v38, 0.0 }
 0x8bf   :  { %607 = vadd.xlane.f32.xlu0 %v606_v40 }
 0x944   :  { %v605_v42 = vpop.xlane.xlu0 %604 }
 0x945   :  { %v609_v43 = vmul.f32 0.03125, %v605_v42  ;;  %v1494_v42 = vld [vmem:[#allocation9 + $0x18] sm:$0xff]  }
 0x947   :  { %v611_v44 = vadd.f32 1e-05, %v609_v43  ;;  %v1495_v43 = vld [vmem:[#allocation9 + $0x10] sm:$0xff]  }
 0x948   :  { %v608_v46 = vpop.xlane.xlu0 %607 }
 0x949   :  { %1514 = vrsqrt.f32 %v611_v44  ;;  %v610_v47 = vmul.f32 0.03125, %v608_v46 }
 0x94b   :  { %v612_v48 = vadd.f32 1e-05, %v610_v47 }
 0x94d   :  { %1516 = vrsqrt.f32 %v612_v48 }
 0x956   :  { %v1515_v50 = vpop.eup %1514 }
 0x957   :  { %v615_v51 = vmul.f32 %v1515_v50, %v599_v31 }
 0x959   :  { %v621_v57 = vmul.f32 %v620_v52, %v615_v51  ;;  %v827_v51 = vrot.slane %v1991_v63, %v347_v55 }
 0x95a   :  { %v1517_v54 = vpop.eup %1516 }
 0x95b   :  { %v616_v56 = vmul.f32 %v1517_v54, %v600_v36  ;;  %v1982_v60 = vadd.f32 %v626_v58, %v621_v57 }
 0x95d   :  { %v622_v59 = vmul.f32 %v620_v52, %v616_v56 }
 0x95f   :  { %v1984_v61 = vadd.f32 %v626_v58, %v622_v59 }
 0x961   :  { %v631_v62 = vpack.c.bf16 %v1984_v61, %v1982_v60 }
 0x963   :  { %1422 = vmatmul.mubr.msk.bf16.vlgmr.msra.gmra.mxu0 %vm173_vm1, %v631_v62 }
 0x964   :  { %1427 = vmatprep.mubr.msk.bf16.mxu0 %vm1769_vm0, %v1768_v1 }
 0xa23   :  { %v690_v0 = vpop.f32.mrf.mxu0 }
 0xa24   :  { %v691_v10 = vadd.f32 %v690_v0, %v640_v9 }
 0xa25   :  { %v1423_v2 = vpop.f32.mrf.mxu0 }
 0xa27   :  { %v693_v5 = vpop.f32.mrf.mxu0 }
 0xa28   :  { %v694_v11 = vadd.f32 %v693_v5, %v640_v9 }
 0xa29   :  { %v1424_v12 = vpop.f32.mrf.mxu0 }
 0xa2a   :  { %v697_v13 = vpack.c.bf16 %v694_v11, %v691_v10 }
 0xa2c   :  { %699 = vrot.lane.b32.xlu0 %v697_v13, %s1770_s9 }
 0xa9e   :  { %v700_v14 = vpop.permute.xlu0 %699 }
 0xa9f   :  { %v705_v15 = vsel %vm173_vm1, %v700_v14, 0 }
 0xaa0   :  { %1426 = vmatpush3.bf16.xpose.msra.mxu0 %v705_v15 }
 0xaa1   :  { %1437 = vmatprep.subr.bf16.mxu0 %v1768_v1 }
 0xaa7   :  { %1428 = vmatmul.mubr.msk.bf16.vlgmr.msra.gmra.mxu0 %vm173_vm1, %v697_v13 }
 0xaa8   :  { %1441 = vmatprep.mubr.msk.bf16.mxu0 %vm1769_vm0, %v1768_v1  ;;  %1438 = vmatpush3.bf16.msra.mxu0 %v1494_v42 }
 0xaa9   :  { %1439 = vmatprep.subr.bf16.mxu0 %v1768_v1 }
 0xaac   :  { %1440 = vmatpush3.bf16.msra.mxu0 %v1495_v43 }
 0xaad   :  { %1453 = vmatprep.subr.bf16.mxu0 %v1768_v1 }
 0xb67   :  { %v741_v8 = vpop.f32.mrf.mxu0 }
 0xb68   :  { %v742_v3 = vadd.f32 %v741_v8, %v1908_v20 }
 0xb69   :  { %v1429_v17 = vpop.f32.mrf.mxu0 }
 0xb6a   :  { %v748_v18 = vsel %vm269_vm2, %v742_v3, -inf  ;;  %v1497_v17 = vld [vmem:[#allocation11 + $0x10] sm:$0xff]  }
 0xb6b   :  { %749 = vmax.xlane.f32.xlu1 %v748_v18  ;;  %v744_v19 = vpop.f32.mrf.mxu0 }
 0xb6c   :  { %v745_v21 = vadd.f32 %v744_v19, %v1911_v24 }
 0xb6d   :  { %v1430_v4 = vpop.f32.mrf.mxu0 }
 0xb6e   :  { %v751_v22 = vsel %vm269_vm2, %v745_v21, -inf }
 0xb6f   :  { %752 = vmax.xlane.f32.xlu1 %v751_v22 }
 0xbf4   :  { %v750_v23 = vpop.xlane.xlu1 %749 }
 0xbf5   :  { %v754_v25 = vsub.f32 %v742_v3, %v750_v23  ;;  %v1496_v3 = vld [vmem:[#allocation11 + $0x18] sm:$0xff]  }
 0xbf7   :  { %v756_v26 = vmul.f32 1.442695, %v754_v25 }
 0xbf8   :  { %v753_v27 = vpop.xlane.xlu1 %752 }
 0xbf9   :  { %1518 = vpow2.f32 %v756_v26  ;;  %v755_v29 = vsub.f32 %v745_v21, %v753_v27  ;;  %v915_v26 = vrot.slane %v1991_v63, %v436_v28 }
 0xbfb   :  { %v758_v30 = vmul.f32 1.442695, %v755_v29 }
 0xbfd   :  { %1520 = vpow2.f32 %v758_v30 }
 0xc06   :  { %v1519_v20 = vpop.eup %1518 }
 0xc07   :  { %v760_v31 = vsel %vm269_vm2, %v1519_v20, 0.0 }
 0xc08   :  { %761 = vadd.xlane.f32.xlu1 %v760_v31 }
 0xc0a   :  { %v1521_v33 = vpop.eup %1520 }
 0xc0b   :  { %v763_v34 = vsel %vm269_vm2, %v1521_v33, 0.0 }
 0xc0c   :  { %764 = vadd.xlane.f32.xlu0 %v763_v34 }
 0xc19   :  { %771 = vrot.lane.b32.xlu1 %v697_v13, %s1761_s29 }
 0xc91   :  { %v762_v24 = vpop.xlane.xlu1 %761 }
 0xc92   :  { %1522 = vrcp.f32 %v762_v24 }
 0xc95   :  { %v765_v35 = vpop.xlane.xlu0 %764  ;;  %v772_v36 = vpop.permute.xlu1 %771 }
 0xc96   :  { %1524 = vrcp.f32 %v765_v35  ;;  %1432 = vmatpush3.bf16.msra.mxu1 %v772_v36 }
 0xc97   :  { %1445 = vmatprep.subr.bf16.mxu1 %v1768_v1 }
 0xc9f   :  { %v1523_v37 = vpop.eup %1522 }
 0xca0   :  { %v767_v40 = vmul.f32 %v1523_v37, %v1519_v20  ;;  %v921_v20 = vrot.slane %v1991_v63, %v442_v32  ;;  %v933_v32 = vrot.slane %v1991_v63, %v453_v45 }
 0xca3   :  { %v1525_v38 = vpop.eup %1524 }
 0xca4   :  { %v769_v41 = vmul.f32 %v1525_v38, %v1521_v33 }
 0xca6   :  { %v770_v39 = vpack.c.bf16 %v769_v41, %v767_v40 }
 0xca8   :  { %1434 = vmatmul.mubr.msk.bf16.vlgmr.msra.gmra.mxu1 %vm269_vm2, %v770_v39 }
 0xca9   :  { %1449 = vmatprep.mubr.msk.bf16.mxu1 %vm1769_vm0, %v1768_v1  ;;  %1446 = vmatpush3.bf16.msra.mxu1 %v1496_v3 }
 0xcaa   :  { %1447 = vmatprep.subr.bf16.mxu1 %v1768_v1 }
 0xcad   :  { %1448 = vmatpush3.bf16.msra.mxu1 %v1497_v17 }
 0xcae   :  { %1461 = vmatprep.subr.bf16.mxu1 %v1768_v1 }
 0xd68   :  { %v811_v44 = vpop.f32.mrf.mxu1 }
 0xd6a   :  { %v1435_v46 = vpop.f32.mrf.mxu1 }
 0xd6c   :  { %v814_v47 = vpop.f32.mrf.mxu1 }
 0xd6d   :  { %v818_v48 = vpack.c.bf16 %v814_v47, %v811_v44 }
 0xd6e   :  { %v1436_v50 = vpop.f32.mrf.mxu1 }
 0xd6f   :  { %1442 = vmatmul.mubr.msk.bf16.vlgmr.msra.gmra.mxu0 %vm173_vm1, %v818_v48 }
 0xd70   :  { %1457 = vmatprep.mubr.msk.bf16.mxu0 %vm1769_vm0, %v1768_v1 }
 0xe2f   :  { %v877_v52 = vpop.f32.mrf.mxu0 }
 0xe30   :  { %v878_v54 = vadd.f32 %v877_v52, %v827_v51 }
 0xe31   :  { %v1443_v56 = vpop.f32.mrf.mxu0 }
 0xe32   :  { %v884_v57 = vadd.f32 %v878_v54, %v1982_v60 }
 0xe33   :  { %v880_v58 = vpop.f32.mrf.mxu0 }
 0xe34   :  { %v881_v59 = vadd.f32 %v880_v58, %v827_v51  ;;  %v886_v62 = vsel %vm173_vm1, %v884_v57, 0.0 }
 0xe35   :  { %887 = vadd.xlane.f32.xlu1 %v886_v62  ;;  %v1444_v0 = vpop.f32.mrf.mxu0 }
 0xe36   :  { %v885_v9 = vadd.f32 %v881_v59, %v1984_v61 }
 0xe38   :  { %v889_v2 = vsel %vm173_vm1, %v885_v9, 0.0 }
 0xe39   :  { %890 = vadd.xlane.f32.xlu0 %v889_v2 }
 0xe46   :  { %1013 = vrot.lane.b32.xlu1 %v1497_v17, %s1761_s29 }
 0xebe   :  { %v888_v5 = vpop.xlane.xlu1 %887 }
 0xebf   :  { %v892_v10 = vmul.f32 0.03125, %v888_v5 }
 0xec1   :  { %v894_v11 = vsub.f32 %v884_v57, %v892_v10  ;;  %v1012_v10 = vrot.slane %v1991_v63, %v532_v16 }
 0xec2   :  { %v891_v55 = vpop.xlane.xlu0 %890  ;;  %v1014_v28 = vpop.permute.xlu1 %1013 }
 0xec3   :  { %v893_v12 = vmul.f32 0.03125, %v891_v55  ;;  %v896_v13 = vmul.f32 %v894_v11, %v894_v11  ;;  %v1021_v37 = vsel %vm538_vm3, %v1014_v28, 0  ;;  %v1098_v28 = vrot.slane %v1991_v63, %v619_v49 }
 0xec4   :  { %v1232_v49 = vstv %s1231_s23 }
 0xec5   :  { %v895_v14 = vsub.f32 %v885_v9, %v893_v12  ;;  %v898_v60 = vsel %vm173_vm1, %v896_v13, 0.0  ;;  %vm1233_vm7 = vcmp.eq.s32.totalorder %v1165_v7, %v1232_v49 }
 0xec6   :  { %899 = vadd.xlane.f32.xlu0 %v898_v60 }
 0xec7   :  { %v897_v15 = vmul.f32 %v895_v14, %v895_v14 }
 0xec9   :  { %v901_v8 = vsel %vm173_vm1, %v897_v15, 0.0 }
 0xeca   :  { %902 = vadd.xlane.f32.xlu0 %v901_v8 }
 0xee0   :  { %1015 = vrot.lane.b32.xlu0 %v1496_v3, %s1761_s29 }
 0xf4f   :  { %v900_v61 = vpop.xlane.xlu0 %899 }
 0xf50   :  { %v904_v18 = vmul.f32 0.03125, %v900_v61 }
 0xf52   :  { %v906_v19 = vadd.f32 1e-05, %v904_v18 }
 0xf53   :  { %v903_v21 = vpop.xlane.xlu0 %902 }
 0xf54   :  { %1526 = vrsqrt.f32 %v906_v19  ;;  %v905_v4 = vmul.f32 0.03125, %v903_v21 }
 0xf56   :  { %v907_v22 = vadd.f32 1e-05, %v905_v4 }
 0xf57   :  { %v1016_v35 = vpop.permute.xlu0 %1015 }
 0xf58   :  { %1528 = vrsqrt.f32 %v907_v22  ;;  %v1024_v36 = vsel %vm538_vm3, %v1016_v35, 0 }
 0xf59   :  { %1454 = vmatpush3.bf16.xpose.msra.mxu0 %v1024_v36 }
 0xf5a   :  { %1455 = vmatprep.subr.bf16.mxu0 %v1768_v1 }
 0xf61   :  { %v1527_v23 = vpop.eup %1526  ;;  %1456 = vmatpush3.bf16.xpose.msra.mxu0 %v1021_v37 }
 0xf62   :  { %v910_v25 = vmul.f32 %v1527_v23, %v894_v11 }
 0xf64   :  { %v916_v30 = vmul.f32 %v915_v26, %v910_v25 }
 0xf65   :  { %v1529_v27 = vpop.eup %1528 }
 0xf66   :  { %v911_v29 = vmul.f32 %v1529_v27, %v895_v14  ;;  %v922_v33 = vadd.f32 %v921_v20, %v916_v30  ;;  %v1110_v27 = vld [vmem:[%s2106_s7] sm:$0x3] }
 0xf68   :  { %v917_v31 = vmul.f32 %v915_v26, %v911_v29  ;;  %v1771_v29 = vmov 0  }
 0xf69   :  { %1485 = vset.pattern.permute.xlu0 %v1771_v29 }
 0xf6a   :  { %v923_v34 = vadd.f32 %v921_v20, %v917_v31 }
 0xf6c   :  { %v929_v24 = vpack.c.bf16 %v923_v34, %v922_v33 }
 0xf6e   :  { %1450 = vmatmul.mubr.msk.bf16.vlgmr.msra.gmra.mxu1 %vm173_vm1, %v929_v24 }
 0xf6f   :  { %1463 = vmatprep.mubr.msk.bf16.mxu1 %vm1769_vm0, %v1768_v1 }
0x102e   :  { %v983_v38 = vpop.f32.mrf.mxu1 }
0x102f   :  { %v984_v40 = vadd.f32 %v983_v38, %v933_v32 }
0x1030   :  { %v1451_v41 = vpop.f32.mrf.mxu1 }
0x1031   :  { %v990_v39 = vmul.f32 %v984_v40, %v984_v40 }
0x1032   :  { %v986_v42 = vpop.f32.mrf.mxu1 }
0x1033   :  { %v992_v43 = vmul.f32 %v990_v39, %v984_v40  ;;  %v987_v44 = vadd.f32 %v986_v42, %v933_v32 }
0x1034   :  { %v1452_v46 = vpop.f32.mrf.mxu1 }
0x1035   :  { %v994_v47 = vmul.f32 0.044715, %v992_v43  ;;  %v991_v48 = vmul.f32 %v987_v44, %v987_v44  ;;  %v1107_v46 = vld [vmem:[%s2105_s6] sm:$0x3]  ;;  %s1772_s6 = smov [#allocation17]  }
0x1036   :  { %s1284_s24 = sshll.u32 %s1772_s6, 4  ;;  %s1285_s24 = int_to_ptr.vmem [resolvable:$true] %s1284_s24 }
0x1037   :  { %v996_v50 = vadd.f32 %v994_v47, %v984_v40  ;;  %v993_v1 = vmul.f32 %v991_v48, %v987_v44  ;;  %v1108_v47 = vpack.c.bf16 %v1107_v46, %v1107_v46  ;;  %v1254_v48 = vstv %s1253_s0  ;;  %s1700_s25 = scalar_lea.vmem %s1285_s24, 32  ;;  %p1705_p13 = scmp.lt.s32.totalorder %s1285_s24, %s1285_s24 }
0x1038   :  { %vm1255_vm13 = vcmp.eq.s32.totalorder %v1165_v7, %v1254_v48  ;;  %p1701_p12 = scmp.ne.s32.totalorder %s1285_s24, %s1700_s25  ;;  %p1706_p0 = scmp.lt.s32.totalorder %s1700_s25, %s1700_s25 }
0x1039   :  { %v998_v51 = vmul.f32 0.7978846, %v996_v50  ;;  %v995_v52 = vmul.f32 0.044715, %v993_v1  ;;  %v1184_v50 = vstv %s1169_s22 }
0x103a   :  { %vm2073_vm14 = vcmp.eq.s32.totalorder %v1165_v7, %v1184_v50  ;;  %p1707_p1 = por %p1706_p0, %p1705_p13 }
0x103b   :  { %1530 = vtanh.f32 %v998_v51  ;;  %v997_v54 = vadd.f32 %v995_v52, %v987_v44 }
0x103c   :  { %p1708_p2 = pnand %p1707_p1, %p1701_p12 }
0x103d   :  { %v999_v56 = vmul.f32 0.7978846, %v997_v54 }
0x103f   :  { %1532 = vtanh.f32 %v999_v56 }
0x1048   :  { %v1531_v57 = vpop.eup %1530 }
0x1049   :  { %v1002_v45 = vadd.f32 1.0, %v1531_v57 }
0x104b   :  { %v1004_v59 = vmul.f32 0.5, %v1002_v45 }
0x104c   :  { %v1533_v58 = vpop.eup %1532 }
0x104d   :  { %v1003_v62 = vadd.f32 1.0, %v1533_v58  ;;  %v1006_v9 = vmul.f32 %v1004_v59, %v984_v40  ;;  %v1104_v40 = vrot.slane %v1991_v63, %v625_v53  ;;  %v1206_v53 = vstv %s1192_s19 }
0x104e   :  { %vm2069_vm8 = vcmp.eq.s32.totalorder %v1165_v7, %v1206_v53 }
0x104f   :  { %v1005_v0 = vmul.f32 0.5, %v1003_v62 }
0x1051   :  { %v1007_v2 = vmul.f32 %v1005_v0, %v987_v44 }
0x1053   :  { %v1008_v5 = vpack.c.bf16 %v1007_v2, %v1006_v9 }
0x1055   :  { %1458 = vmatmul.mubr.msk.bf16.vlgmr.msra.gmra.mxu0 %vm538_vm3, %v1008_v5 }
0x1115   :  { %v1060_v11 = vpop.f32.mrf.mxu0 }
0x1116   :  { %v1061_v55 = vadd.f32 %v1060_v11, %v1012_v10 }
0x1117   :  { %v1459_v12 = vpop.f32.mrf.mxu0 }
0x1118   :  { %v1067_v13 = vadd.f32 %v1061_v55, %v922_v33 }
0x1119   :  { %v1063_v14 = vpop.f32.mrf.mxu0 }
0x111a   :  { %v1064_v60 = vadd.f32 %v1063_v14, %v1012_v10  ;;  %v1069_v15 = vsel %vm173_vm1, %v1067_v13, 0.0 }
0x111b   :  { %1070 = vadd.xlane.f32.xlu0 %v1069_v15  ;;  %v1460_v8 = vpop.f32.mrf.mxu0 }
0x111c   :  { %v1068_v3 = vadd.f32 %v1064_v60, %v923_v34 }
0x111e   :  { %v1072_v17 = vsel %vm173_vm1, %v1068_v3, 0.0 }
0x111f   :  { %1073 = vadd.xlane.f32.xlu1 %v1072_v17 }
0x11a4   :  { %v1071_v61 = vpop.xlane.xlu0 %1070 }
0x11a5   :  { %v1075_v18 = vmul.f32 0.03125, %v1071_v61 }
0x11a7   :  { %v1077_v19 = vsub.f32 %v1067_v13, %v1075_v18 }
0x11a8   :  { %v1074_v21 = vpop.xlane.xlu1 %1073 }
0x11a9   :  { %v1076_v4 = vmul.f32 0.03125, %v1074_v21  ;;  %v1079_v16 = vmul.f32 %v1077_v19, %v1077_v19 }
0x11ab   :  { %v1078_v22 = vsub.f32 %v1068_v3, %v1076_v4  ;;  %v1081_v23 = vsel %vm173_vm1, %v1079_v16, 0.0 }
0x11ac   :  { %1082 = vadd.xlane.f32.xlu0 %v1081_v23 }
0x11ad   :  { %v1080_v25 = vmul.f32 %v1078_v22, %v1078_v22 }
0x11af   :  { %v1084_v26 = vsel %vm173_vm1, %v1080_v25, 0.0 }
0x11b0   :  { %1085 = vadd.xlane.f32.xlu0 %v1084_v26 }
0x11c6   :  { %1113 = vperm.xlu0 %1485, %v1110_v27  }
0x1235   :  { %v1083_v30 = vpop.xlane.xlu0 %1082 }
0x1236   :  { %v1087_v20 = vmul.f32 0.03125, %v1083_v30 }
0x1238   :  { %v1089_v31 = vadd.f32 1e-05, %v1087_v20 }
0x1239   :  { %v1086_v33 = vpop.xlane.xlu0 %1085 }
0x123a   :  { %1534 = vrsqrt.f32 %v1089_v31  ;;  %v1088_v34 = vmul.f32 0.03125, %v1086_v33 }
0x123c   :  { %v1090_v24 = vadd.f32 1e-05, %v1088_v34 }
0x123e   :  { %1536 = vrsqrt.f32 %v1090_v24 }
0x1241   :  { %v1114_v63 = vpop.permute.xlu0 %1113 }
0x1247   :  { %v1535_v35 = vpop.eup %1534 }
0x1248   :  { %v1093_v36 = vmul.f32 %v1535_v35, %v1077_v19 }
0x124a   :  { %v1099_v38 = vmul.f32 %v1098_v28, %v1093_v36 }
0x124b   :  { %v1537_v37 = vpop.eup %1536 }
0x124c   :  { %v1094_v32 = vmul.f32 %v1537_v37, %v1078_v22  ;;  %v1105_v39 = vadd.f32 %v1104_v40, %v1099_v38 }
0x124e   :  { %v1100_v41 = vmul.f32 %v1098_v28, %v1094_v32 }
0x1250   :  { %v1106_v42 = vadd.f32 %v1104_v40, %v1100_v41 }
0x1252   :  { %v1109_v43 = vpack.c.bf16 %v1106_v42, %v1105_v39 }
0x1254   :  { %v1120_v44 = vsel %vm173_vm1, %v1109_v43, 0 }
0x1255   :  { %1462 = vmatpush3.bf16.xpose.msra.mxu1 %v1120_v44 }
0x125c   :  { %1464 = vmatmul.mubr.msk.bf16.vlgmr.msra.gmra.mxu1 %vm173_vm1, %v1108_v47 }
0x131c   :  { %v1156_v1 = vpop.f32.mrf.mxu1 }
0x131d   :  { %v1157_v52 = vadd.f32 %v1156_v1, %v1114_v63 }
0x131e   :  { %v1465_v6 = vpop.f32.mrf.mxu1 }
0x131f   :  { %v1170_v56 = vsel %vm1167_vm6, %v1157_v52, -1e+30  ;;  %v1234_v57 = vsel %vm1233_vm7, %v1157_v52, 0.0  ;;  %v1208_v45 = vsel %vm2069_vm8, %v1157_v52, 0.0  ;;  %1163 = vst.msk [vmem:[#allocation17] sm:$0x3] %vm1162_vm9, %v1157_v52 }
0x1320   :  { %v1159_v58 = vpop.f32.mrf.mxu1  ;;  %v1194_v59 = vsel %vm1193_vm10, %v1170_v56, -inf  ;;  %v1235_v62 = vsel %vm1171_vm11, %v1234_v57, 0.0  ;;  %v1218_v0 = vsel %vm1216_vm12, %v1157_v52, -1e+30  ;;  %v1256_v9 = vsel %vm1255_vm13, %v1157_v52, 0.0 }
0x1321   :  { %1195 = vmax.xlane.f32.xlu1 %v1194_v59  ;;  %1236 = vadd.xlane.f32.xlu0 %v1235_v62  ;;  %v1186_v2 = vsel %vm2073_vm14, %v1157_v52, 0.0  ;;  %v1241_v10 = vsel %vm1193_vm10, %v1218_v0, -inf  ;;  %v1172_v11 = vsel %vm1171_vm11, %v1170_v56, -inf  ;;  %v1219_v55 = vsel %vm1171_vm11, %v1218_v0, -inf }
0x1322   :  { %v1466_v5 = vpop.f32.mrf.mxu1  ;;  %v1209_v30 = vsel %vm1193_vm10, %v1208_v45, 0.0  ;;  %v1257_v20 = vsel %vm1193_vm10, %v1256_v9, 0.0  ;;  %v1187_v31 = vsel %vm1171_vm11, %v1186_v2, 0.0 }
0x1325   :  { %1242 = vmax.xlane.f32.xlu1 %v1241_v10 }
0x1329   :  { %1173 = vmax.xlane.f32.xlu1 %v1172_v11 }
0x132d   :  { %1220 = vmax.xlane.f32.xlu1 %v1219_v55 }
0x13aa   :  { %v1196_v12 = vpop.xlane.xlu1 %1195 }
0x13ab   :  { %v1197_v13 = vsub.f32 %v1170_v56, %v1196_v12 }
0x13ad   :  { %v1198_v14 = vmul.f32 1.442695, %v1197_v13 }
0x13ae   :  { %v1243_v60 = vpop.xlane.xlu1 %1242 }
0x13af   :  { %1538 = vpow2.f32 %v1198_v14  ;;  %v1244_v15 = vsub.f32 %v1218_v0, %v1243_v60 }
0x13b1   :  { %v1245_v8 = vmul.f32 1.442695, %v1244_v15 }
0x13b2   :  { %v1174_v3 = vpop.xlane.xlu1 %1173 }
0x13b3   :  { %1540 = vpow2.f32 %v1245_v8  ;;  %v1175_v17 = vsub.f32 %v1170_v56, %v1174_v3 }
0x13b5   :  { %v1176_v61 = vmul.f32 1.442695, %v1175_v17 }
0x13b6   :  { %v1221_v18 = vpop.xlane.xlu1 %1220 }
0x13b7   :  { %1542 = vpow2.f32 %v1176_v61  ;;  %v1222_v19 = vsub.f32 %v1218_v0, %v1221_v18 }
0x13b9   :  { %v1223_v21 = vmul.f32 1.442695, %v1222_v19 }
0x13bb   :  { %1544 = vpow2.f32 %v1223_v21 }
0x13bc   :  { %v1539_v4 = vpop.eup %1538 }
0x13bd   :  { %v1200_v16 = vsel %vm1193_vm10, %v1539_v4, 0.0 }
0x13be   :  { %1201 = vadd.xlane.f32.xlu1 %v1200_v16 }
0x13c0   :  { %v1541_v22 = vpop.eup %1540 }
0x13c1   :  { %v1247_v23 = vsel %vm1193_vm10, %v1541_v22, 0.0 }
0x13c2   :  { %1248 = vadd.xlane.f32.xlu1 %v1247_v23 }
0x13c4   :  { %v1543_v25 = vpop.eup %1542 }
0x13c5   :  { %v1178_v26 = vsel %vm1171_vm11, %v1543_v25, 0.0 }
0x13c6   :  { %1179 = vadd.xlane.f32.xlu1 %v1178_v26 }
0x13c8   :  { %v1545_v27 = vpop.eup %1544 }
0x13c9   :  { %v1225_v29 = vsel %vm1171_vm11, %v1545_v27, 0.0 }
0x13ca   :  { %1226 = vadd.xlane.f32.xlu1 %v1225_v29 }
0x13ce   :  { %1210 = vadd.xlane.f32.xlu1 %v1209_v30 }
0x13d2   :  { %1258 = vadd.xlane.f32.xlu1 %v1257_v20 }
0x13d6   :  { %1188 = vadd.xlane.f32.xlu1 %v1187_v31 }
0x13d7   :  { %1711 = shalt.err (!%p1708_p2)
}
0x13d8   :  { %1287 = dma.vmem_to_hbm [thread:$0]  %s1285_s24, 32, %s2109_s10, [#allocation4]   ;;  %v1237_v48 = vpop.xlane.xlu0 %1236  ;;  %vm1276_vm0 = vcmask 0  }
0x13d9   :  { %s1773_s10 = smov [#allocation18]  }
0x13da   :  { %s1294_s28 = sshll.u32 %s1773_s10, 4  ;;  %s1295_s28 = int_to_ptr.vmem [resolvable:$true] %s1294_s28 }
0x13db   :  { %s1720_s12 = scalar_lea.vmem %s1295_s28, 16  ;;  %s1724_s2 = scalar_lea.vmem %s1295_s28, 32 }
0x13dc   :  { %p1721_p3 = scmp.ne.s32.totalorder %s1295_s28, %s1720_s12  ;;  %p1725_p4 = scmp.lt.s32.totalorder %s1295_s28, %s1295_s28 }
0x13dd   :  { %p1726_p5 = scmp.lt.s32.totalorder %s1724_s2, %s1720_s12 }
0x13df   :  { %p1727_p6 = por %p1726_p5, %p1725_p4 }
0x13e1   :  { %p1728_p7 = pnand %p1727_p6, %p1721_p3 }
0x1447   :  { %v1202_v33 = vpop.xlane.xlu1 %1201 }
0x1448   :  { %1546 = vlog2.f32 %v1202_v33 }
0x144b   :  { %v1249_v34 = vpop.xlane.xlu1 %1248 }
0x144c   :  { %1548 = vlog2.f32 %v1249_v34 }
0x144f   :  { %v1180_v24 = vpop.xlane.xlu1 %1179 }
0x1450   :  { %1550 = vlog2.f32 %v1180_v24 }
0x1453   :  { %v1227_v35 = vpop.xlane.xlu1 %1226 }
0x1454   :  { %1552 = vlog2.f32 %v1227_v35 }
0x1455   :  { %v1547_v36 = vpop.eup %1546 }
0x1456   :  { %v1204_v37 = vmul.f32 0.6931472, %v1547_v36 }
0x1457   :  { %v1211_v28 = vpop.xlane.xlu1 %1210 }
0x1458   :  { %v1205_v40 = vadd.f32 %v1204_v37, %v1196_v12 }
0x1459   :  { %v1549_v32 = vpop.eup %1548 }
0x145a   :  { %v1251_v38 = vmul.f32 0.6931472, %v1549_v32  ;;  %v1212_v46 = vsub.f32 %v1205_v40, %v1211_v28 }
0x145b   :  { %v1259_v42 = vpop.xlane.xlu1 %1258 }
0x145c   :  { %v1252_v41 = vadd.f32 %v1251_v38, %v1243_v60 }
0x145d   :  { %v1551_v39 = vpop.eup %1550 }
0x145e   :  { %v1182_v43 = vmul.f32 0.6931472, %v1551_v39  ;;  %v1260_v44 = vsub.f32 %v1252_v41, %v1259_v42 }
0x145f   :  { %v1189_v50 = vpop.xlane.xlu1 %1188 }
0x1460   :  { %v1261_v49 = vadd.f32 %v1260_v44, %v1212_v46  ;;  %v1183_v53 = vadd.f32 %v1182_v43, %v1174_v3 }
0x1461   :  { %v1553_v47 = vpop.eup %1552 }
0x1462   :  { %v1229_v7 = vmul.f32 0.6931472, %v1553_v47  ;;  %v1264_v1 = vmul.f32 0.5, %v1261_v49  ;;  %v1190_v52 = vsub.f32 %v1183_v53, %v1189_v50 }
0x1464   :  { %v1230_v63 = vadd.f32 %v1229_v7, %v1221_v18  ;;  %v1266_v54 = vrot.slane %v1264_v1, 1 }
0x1466   :  { %v1238_v51 = vsub.f32 %v1230_v63, %v1237_v48 }
0x1468   :  { %v1239_v6 = vadd.f32 %v1238_v51, %v1190_v52 }
0x146a   :  { %v1263_v56 = vmul.f32 0.5, %v1239_v6 }
0x146c   :  { %v1268_v57 = vmul.f32 %v1266_v54, %v1263_v56 }
0x146e   :  { %1554 = vrsqrt.f32 %v1268_v57  ;;  %vm1271_vm15 = vcmp.eq.f32.partialorder %v1268_v57, inf  ;;  %v1274_v59 = vand.u32 2147483648, %v1268_v57  ;;  %vm1273_vm1 = vcmp.eq.f32.partialorder %v1268_v57, 0.0 }
0x147b   :  { %v1555_v45 = vpop.eup %1554 }
0x147c   :  { %v1270_v58 = vmul.f32 %v1555_v45, %v1268_v57 }
0x147e   :  { %v1272_v62 = vsel %vm1271_vm15, %v1268_v57, %v1270_v58 }
0x147f   :  { %v1275_v0 = vsel %vm1273_vm1, %v1274_v59, %v1272_v62 }
0x1480   :  { %1277 = vst.msk [vmem:[#allocation18] sm:$0x1] %vm1276_vm0, %v1275_v0 }
0x1481   :  { %1731 = shalt.err (!%p1728_p7)
}
0x1482   :  { %1297 = dma.vmem_to_hbm [thread:$0]  %s1295_s28, 16, %s2110_s11, [#allocation19]  }
0x1483   :  { %1752 = dma.done.wait [#allocation4], 32  }
0x1484   :  { %1753 = vsyncadd [#allocation4], 4294967264 }
0x1485   :  { %1754 = dma.done.wait [#allocation19], 16  }
0x1486   :  { %1755 = vsyncadd [#allocation19], 4294967280 }
0x1487   :  { %1304 = vsyncpa [#allocation3], 1 }
0x1488   :  { %1305 = vsyncpa [#allocation7], 1 }
0x1489   :  { %1306 = vsyncpa [#allocation10], 1 }
0x148a   :  { %1307 = vsyncpa [#allocation13], 1 }
0x148b   :  { %1308 = vsyncpa [#allocation4], 1 }
0x148c   :  { %1309 = vsyncpa [#allocation19], 1 }
0x148d   :  { %1310 = vsyncpa [#allocation5], 1 }
0x148e   :  { %1311 = vsyncpa [#allocation16], 1 }

</bundles_post_ra>
